<compile_context>
chip_gen: v7x
topology: tpu7x:2x2x1
jax: 0.10.0
libtpu: 0.0.40
codegen_flags: <defaults>
</compile_context>

<pallas_src>
import functools

import jax
import jax.numpy as jnp
from jax.experimental import pallas as pl
from jax.experimental.pallas import tpu as pltpu


# --------------------------------------------------------------------------
# helpers
# --------------------------------------------------------------------------
def _pick_spatial_tile(hw, max_tile=8192):
    """Largest spatial (lane) tile: full HW if small, else a 128-aligned divisor."""
    if hw <= max_tile:
        return hw
    for t in range(max_tile - max_tile % 128, 0, -128):
        if hw % t == 0:
            return t
    # TODO(synk): HW with no 128-aligned divisor falls back to one full-HW
    # block; add a padded + masked ragged-tile path if such shapes must run
    # within v7x's 64 MiB VMEM.
    return hw


# --------------------------------------------------------------------------
# Fused kernel:
#   normalize(folded) -> stacked 1x1 conv (MXU) -> heatmap conv (MXU)
#   -> GAP accumulators (pose_gap, feat_global)
#   -> online-softmax pose-attention pooling (feat_local) with visibility head
#   -> both embedding heads fused into the finalize step
# Grid: (N, HW // T), batch "parallel", spatial "arbitrary" (reduction).
# --------------------------------------------------------------------------
def _fused_backbone_kernel(x_ref, wstk_ref, bstk_ref, whm_ref, bhm_ref,
                           wvis_ref, bvis_ref, whg_ref, bhg_ref, whl_ref, bhl_ref,
                           og_ref, ol_ref,
                           psum_ref, fgsum_ref, m_ref, l_ref, parts_ref,
                           *, inv_hw, c_pose):
    s = pl.program_id(1)
    last = pl.num_programs(1) - 1

    x = x_ref[0]                                                     # (C, T) bf16

    # ---- stacked 1x1 convs on the MXU (pixel normalization folded into weights)
    combined = jnp.dot(wstk_ref[...], x,
                       preferred_element_type=jnp.float32)           # (Cp+D, T) f32
    combined = jnp.maximum(combined + bstk_ref[...], 0.0)
    pose_feat = combined[:c_pose]                                     # (Cp, T) f32
    featmap = combined[c_pose:]                                       # (D,  T) f32

    pose_bf = pose_feat.astype(jnp.bfloat16)
    feat_bf = featmap.astype(jnp.bfloat16)

    # heatmap 1x1 conv on the MXU
    heatmap = jnp.dot(whm_ref[...], pose_bf,
                      preferred_element_type=jnp.float32) + bhm_ref[...]   # (K, T)

    @pl.when(s == 0)
    def _init():
        psum_ref[...] = jnp.zeros_like(psum_ref)
        fgsum_ref[...] = jnp.zeros_like(fgsum_ref)
        m_ref[...] = jnp.full_like(m_ref, -jnp.inf)
        l_ref[...] = jnp.zeros_like(l_ref)
        parts_ref[...] = jnp.zeros_like(parts_ref)

    # ---- global average pools: accumulate lane-reduced partial sums ---------
    psum_ref[...] += jnp.sum(pose_feat, axis=-1, keepdims=True)       # (Cp, 1)
    fgsum_ref[...] += jnp.sum(featmap, axis=-1, keepdims=True)        # (D, 1)

    # ---- pose-attention pooling: online softmax over the spatial axis -------
    m_prev = m_ref[...]                                               # (K, 1)
    m_new = jnp.maximum(m_prev, jnp.max(heatmap, axis=-1, keepdims=True))
    alpha = jnp.exp(m_prev - m_new)                                   # (K, 1)
    p = jnp.exp(heatmap - m_new)                                      # (K, T)
    l_ref[...] = alpha * l_ref[...] + jnp.sum(p, axis=-1, keepdims=True)
    # parts accumulated as (D, K): the big (D, T) featmap is the natural MXU
    # lhs, only the tiny (K, T) softmax tensor gets re-laid.
    contrib = jax.lax.dot_general(feat_bf, p.astype(jnp.bfloat16),
                                  (((1,), (1,)), ((), ())),
                                  preferred_element_type=jnp.float32)  # (D, K)
    parts_ref[...] = jnp.transpose(alpha) * parts_ref[...] + contrib
    m_ref[...] = m_new

    @pl.when(s == last)
    def _finalize():
        # visibility head: sigmoid(W_vis @ pose_gap + b_vis) — tiny, unrolled VPU
        pose_gap = psum_ref[...] * inv_hw                             # (Cp, 1)
        wv = wvis_ref[...]
        vis_logits = bvis_ref[...]                                    # (K, 1)
        for cc in range(wv.shape[1]):
            vis_logits = vis_logits + wv[:, cc:cc + 1] * pose_gap[cc:cc + 1, :]
        vis = 1.0 / (1.0 + jnp.exp(-vis_logits))                      # (K, 1)

        # visibility-weighted average of softmax-normalized keypoint parts
        w_col = vis / l_ref[...]                                      # (K, 1)
        parts = parts_ref[...]                                        # (D, K)
        fl_col = parts[:, 0:1] * w_col[0:1, :]
        for kk in range(1, parts.shape[1]):
            fl_col = fl_col + parts[:, kk:kk + 1] * w_col[kk:kk + 1, :]
        den = jnp.sum(vis, axis=0, keepdims=True) + 1e-6              # (1, 1)
        fl_col = fl_col / den                                         # (D, 1)

        fg_col = fgsum_ref[...] * inv_hw                              # (D, 1)

        # fused embedding heads: (1,D)@(D,D), lane-dense output writes
        fg_row = jnp.transpose(fg_col)                                # (1, D)
        fl_row = jnp.transpose(fl_col)                                # (1, D)
        og_ref[0] = (jnp.dot(fg_row, whg_ref[...],
                             preferred_element_type=jnp.float32)
                     + bhg_ref[...]).astype(og_ref.dtype)
        ol_ref[0] = (jnp.dot(fl_row, whl_ref[...],
                             preferred_element_type=jnp.float32)
                     + bhl_ref[...]).astype(ol_ref.dtype)


# --------------------------------------------------------------------------
# Parameter construction (deterministic, in-script, channels-first weights)
# --------------------------------------------------------------------------
def make_params(key, c_in=3, c_pose=8, n_kpt=4, d_feat=32):
    ks = jax.random.split(key, 12)
    f32 = jnp.float32

    def init(k, shape, scale=0.1):
        return (scale * jax.random.normal(k, shape)).astype(f32)

    return {
        # cfg.MODEL.PIXEL_MEAN / PIXEL_STD buffers
        'pixel_mean': jnp.asarray([123.675, 116.28, 103.53], f32),
        'pixel_std': jnp.asarray([58.395, 57.12, 57.375], f32),
        # pose_net.backbone : 1x1 conv 3 -> c_pose (+ReLU)   [weights (Cout, Cin)]
        'w_pose': init(ks[0], (c_pose, c_in)),
        'b_pose': init(ks[1], (c_pose, 1), 0.05),
        # pose_net.head : heatmap conv c_pose -> n_kpt, visibility linear
        'w_hm': init(ks[2], (n_kpt, c_pose)),
        'b_hm': init(ks[3], (n_kpt, 1), 0.05),
        'w_vis': init(ks[4], (n_kpt, c_pose)),
        'b_vis': init(ks[5], (n_kpt, 1), 0.05),
        # reid backbone : 1x1 conv 3 -> d_feat (+ReLU)
        'w_feat': init(ks[6], (d_feat, c_in)),
        'b_feat': init(ks[7], (d_feat, 1), 0.05),
        # global / local heads (eval-mode bottleneck projections)
        'w_head_g': init(ks[8], (d_feat, d_feat)),
        'b_head_g': init(ks[9], (1, d_feat), 0.05),
        'w_head_l': init(ks[10], (d_feat, d_feat)),
        'b_head_l': init(ks[11], (1, d_feat), 0.05),
    }


# --------------------------------------------------------------------------
# Forward pass (eval): returns {'global': (N, D), 'local': (N, D)}
# --------------------------------------------------------------------------
def pose_baseline_forward(images_nchw, params, *, max_tile=8192):
    n, c, h, w = images_nchw.shape
    hw = h * w
    # (N, C, HW): HW lane-dense; bf16 to halve image DMA / VMEM tiles.
    x = images_nchw.reshape(n, c, hw).astype(jnp.bfloat16)

    c_pose = params['w_pose'].shape[0]
    k_pts = params['w_hm'].shape[0]
    d_feat = params['w_feat'].shape[0]

    # ---- fold preprocess_image ((x-mean)/std) into the two input convs ------
    inv_std = 1.0 / params['pixel_std']                               # (C,)
    shift = params['pixel_mean'] * inv_std                            # (C,)

    def fold(w_oc, b_o1):
        w_f = (w_oc * inv_std[None, :]).astype(jnp.float32)
        b_f = (b_o1 - (w_oc @ shift)[:, None]).astype(jnp.float32)
        return w_f, b_f

    wp_f, bp_f = fold(params['w_pose'], params['b_pose'])
    wf_f, bf_f = fold(params['w_feat'], params['b_feat'])

    # stack pose + feature conv weights -> ONE (Cp+D, C) MXU matmul per tile
    w_stack = jnp.concatenate([wp_f, wf_f], axis=0).astype(jnp.bfloat16)
    b_stack = jnp.concatenate([bp_f, bf_f], axis=0)                   # f32
    w_hm_bf = params['w_hm'].astype(jnp.bfloat16)

    t = _pick_spatial_tile(hw, max_tile=max_tile)
    assert hw % t == 0
    grid = (n, hw // t)

    def _const_spec(arr):
        nd = arr.ndim
        return pl.BlockSpec(arr.shape, lambda *_: (0,) * nd)

    cost = pl.CostEstimate(
        flops=int(2 * n * hw * (c * (c_pose + d_feat) + c_pose * k_pts
                                + k_pts * d_feat)
                  + 4 * n * d_feat * d_feat),
        transcendentals=int(n * hw * k_pts),
        bytes_accessed=int(2 * x.size                                  # bf16 image
                           + 2 * (w_stack.size + w_hm_bf.size)
                           + 4 * (b_stack.size + params['b_hm'].size
                                  + params['w_vis'].size + params['b_vis'].size
                                  + params['w_head_g'].size + params['b_head_g'].size
                                  + params['w_head_l'].size + params['b_head_l'].size
                                  + 2 * n * d_feat)),
    )

    out_g3, out_l3 = pl.pallas_call(
        functools.partial(_fused_backbone_kernel, inv_hw=1.0 / hw, c_pose=c_pose),
        out_shape=(jax.ShapeDtypeStruct((n, 1, d_feat), jnp.float32),   # 'global'
                   jax.ShapeDtypeStruct((n, 1, d_feat), jnp.float32)),  # 'local'
        grid_spec=pltpu.PrefetchScalarGridSpec(
            num_scalar_prefetch=0,
            grid=grid,
            in_specs=[
                pl.BlockSpec((1, c, t), lambda i, s: (i, 0, s)),        # image tile
                _const_spec(w_stack), _const_spec(b_stack),
                _const_spec(w_hm_bf), _const_spec(params['b_hm']),
                _const_spec(params['w_vis']), _const_spec(params['b_vis']),
                _const_spec(params['w_head_g']), _const_spec(params['b_head_g']),
                _const_spec(params['w_head_l']), _const_spec(params['b_head_l']),
            ],
            out_specs=[
                pl.BlockSpec((1, 1, d_feat), lambda i, s: (i, 0, 0)),   # resident over s
                pl.BlockSpec((1, 1, d_feat), lambda i, s: (i, 0, 0)),   # resident over s
            ],
            scratch_shapes=[
                pltpu.VMEM((c_pose, 1), jnp.float32),        # pose GAP accumulator
                pltpu.VMEM((d_feat, 1), jnp.float32),        # featmap GAP accumulator
                pltpu.VMEM((k_pts, 1), jnp.float32),         # online-softmax running max
                pltpu.VMEM((k_pts, 1), jnp.float32),         # online-softmax running denom
                pltpu.VMEM((d_feat, k_pts), jnp.float32),    # running weighted parts (D,K)
            ],
        ),
        compiler_params=pltpu.CompilerParams(
            dimension_semantics=("parallel", "arbitrary"),
            vmem_limit_bytes=48 * 1024 * 1024),               # fits v7x 64 MiB physical
        cost_estimate=cost,
    )(x, w_stack, b_stack, w_hm_bf, params['b_hm'],
      params['w_vis'], params['b_vis'],
      params['w_head_g'], params['b_head_g'],
      params['w_head_l'], params['b_head_l'])

    return {'global': out_g3[:, 0, :], 'local': out_l3[:, 0, :]}


# --------------------------------------------------------------------------
# Pure-JAX reference (same math, un-fused, f32) for a correctness cross-check
# --------------------------------------------------------------------------
def pose_baseline_reference(images_nchw, params):
    n, c, h, w = images_nchw.shape
    hw = h * w
    x = images_nchw.reshape(n, c, hw)
    xn = (x - params['pixel_mean'].reshape(1, c, 1)) / params['pixel_std'].reshape(1, c, 1)

    pose_feat = jnp.maximum(
        jnp.einsum('oc,nch->noh', params['w_pose'], xn) + params['b_pose'][None], 0.0)
    heatmap = jnp.einsum('ok,nkh->noh', params['w_hm'], pose_feat) + params['b_hm'][None]
    pose_gap = jnp.mean(pose_feat, axis=-1)                                   # (N, Cp)
    vis = jax.nn.sigmoid(pose_gap @ params['w_vis'].T + params['b_vis'][:, 0][None])

    featmap = jnp.maximum(
        jnp.einsum('oc,nch->noh', params['w_feat'], xn) + params['b_feat'][None], 0.0)
    feat_global = jnp.mean(featmap, axis=-1)                                  # (N, D)

    attn = jax.nn.softmax(heatmap, axis=-1)                                   # (N, K, HW)
    parts = jnp.einsum('nkh,ndh->nkd', attn, featmap)                         # (N, K, D)
    feat_local = (jnp.sum(parts * vis[:, :, None], axis=1)
                  / (jnp.sum(vis, axis=-1, keepdims=True) + 1e-6))            # (N, D)

    out_g = feat_global @ params['w_head_g'] + params['b_head_g']
    out_l = feat_local @ params['w_head_l'] + params['b_head_l']
    return {'global': out_g, 'local': out_l}


if __name__ == "__main__":
    key = jax.random.PRNGKey(0)
    k_img, k_param = jax.random.split(key)

    # small NCHW ReID image batch
    images = jax.random.uniform(k_img, (2, 3, 16, 16), dtype=jnp.float32) * 255.0
    params = make_params(k_param)
    ref = pose_baseline_reference(images, params)

    # single-spatial-tile path
    fwd = jax.jit(pose_baseline_forward)
    out = fwd(images, params)
    jax.block_until_ready(out)

    assert out['global'].shape == (2, 32) and out['local'].shape == (2, 32)
    assert bool(jnp.all(jnp.isfinite(out['global']))) and bool(jnp.all(jnp.isfinite(out['local'])))
    assert bool(jnp.allclose(out['global'], ref['global'], rtol=5e-2, atol=1e-2))
    assert bool(jnp.allclose(out['local'], ref['local'], rtol=5e-2, atol=1e-2))

    # multi-spatial-tile path (exercises the online-softmax / GAP accumulators)
    fwd_tiled = jax.jit(functools.partial(pose_baseline_forward, max_tile=128))
    out_t = fwd_tiled(images, params)
    jax.block_until_ready(out_t)
    assert bool(jnp.allclose(out_t['global'], ref['global'], rtol=5e-2, atol=1e-2))
    assert bool(jnp.allclose(out_t['local'], ref['local'], rtol=5e-2, atol=1e-2))

    print("KERNEL_OK")
</pallas_src>

<mosaic_0001>
module attributes {stable_mosaic.version = 11 : i64} {
  func.func @_fused_backbone_kernel(%arg0: i32, %arg1: i32, %arg2: memref<1x3x256xbf16, #tpu.memory_space<vmem>>, %arg3: memref<40x3xbf16, #tpu.memory_space<vmem>>, %arg4: memref<40x1xf32, #tpu.memory_space<vmem>>, %arg5: memref<4x8xbf16, #tpu.memory_space<vmem>>, %arg6: memref<4x1xf32, #tpu.memory_space<vmem>>, %arg7: memref<4x8xf32, #tpu.memory_space<vmem>>, %arg8: memref<4x1xf32, #tpu.memory_space<vmem>>, %arg9: memref<32x32xf32, #tpu.memory_space<vmem>>, %arg10: memref<1x32xf32, #tpu.memory_space<vmem>>, %arg11: memref<32x32xf32, #tpu.memory_space<vmem>>, %arg12: memref<1x32xf32, #tpu.memory_space<vmem>>, %arg13: memref<1x1x32xf32, #tpu.memory_space<vmem>>, %arg14: memref<1x1x32xf32, #tpu.memory_space<vmem>>, %arg15: memref<8x1xf32, #tpu.memory_space<vmem>>, %arg16: memref<32x1xf32, #tpu.memory_space<vmem>>, %arg17: memref<4x1xf32, #tpu.memory_space<vmem>>, %arg18: memref<4x1xf32, #tpu.memory_space<vmem>>, %arg19: memref<32x4xf32, #tpu.memory_space<vmem>>) attributes {dimension_semantics = [#tpu.dimension_semantics<parallel>, #tpu.dimension_semantics<arbitrary>], iteration_bounds = array<i64: 2, 1>, scalar_prefetch = 0 : i64, scratch_operands = 5 : i64, tpu.core_type = #tpu.core_type<tc>, window_params = [{transform_indices = @transform_0, window_bounds = array<i64: 1, 3, 256>}, {pipeline_mode = #tpu.pipeline_mode<synchronous>, transform_indices = @transform_1, window_bounds = array<i64: 40, 3>}, {pipeline_mode = #tpu.pipeline_mode<synchronous>, transform_indices = @transform_2, window_bounds = array<i64: 40, 1>}, {pipeline_mode = #tpu.pipeline_mode<synchronous>, transform_indices = @transform_3, window_bounds = array<i64: 4, 8>}, {pipeline_mode = #tpu.pipeline_mode<synchronous>, transform_indices = @transform_4, window_bounds = array<i64: 4, 1>}, {pipeline_mode = #tpu.pipeline_mode<synchronous>, transform_indices = @transform_5, window_bounds = array<i64: 4, 8>}, {pipeline_mode = #tpu.pipeline_mode<synchronous>, transform_indices = @transform_6, window_bounds = array<i64: 4, 1>}, {pipeline_mode = #tpu.pipeline_mode<synchronous>, transform_indices = @transform_7, window_bounds = array<i64: 32, 32>}, {pipeline_mode = #tpu.pipeline_mode<synchronous>, transform_indices = @transform_8, window_bounds = array<i64: 1, 32>}, {pipeline_mode = #tpu.pipeline_mode<synchronous>, transform_indices = @transform_9, window_bounds = array<i64: 32, 32>}, {pipeline_mode = #tpu.pipeline_mode<synchronous>, transform_indices = @transform_10, window_bounds = array<i64: 1, 32>}, {transform_indices = @transform_11, window_bounds = array<i64: 1, 1, 32>}, {transform_indices = @transform_12, window_bounds = array<i64: 1, 1, 32>}]} {
    %c0 = arith.constant 0 : index
    %c0_0 = arith.constant 0 : index
    %c0_1 = arith.constant 0 : index
    %0 = vector.load %arg2[%c0, %c0_0, %c0_1] : memref<1x3x256xbf16, #tpu.memory_space<vmem>>, vector<1x3x256xbf16>
    %1 = vector.shape_cast %0 : vector<1x3x256xbf16> to vector<3x256xbf16>
    %c0_2 = arith.constant 0 : index
    %c0_3 = arith.constant 0 : index
    %2 = vector.load %arg3[%c0_2, %c0_3] : memref<40x3xbf16, #tpu.memory_space<vmem>>, vector<40x3xbf16>
    %cst = arith.constant dense<0.000000e+00> : vector<40x256xf32>
    %3 = tpu.matmul %2, %1, %cst {dimension_numbers = #tpu.dot_dimension_numbers<[1], [0], [0], [1], [0, 0, 1, 1], [], []>} : vector<40x3xbf16>, vector<3x256xbf16>, vector<40x256xf32> -> vector<40x256xf32>
    %c0_4 = arith.constant 0 : index
    %c0_5 = arith.constant 0 : index
    %4 = vector.load %arg4[%c0_4, %c0_5] : memref<40x1xf32, #tpu.memory_space<vmem>>, vector<40x1xf32>
    %5 = vector.broadcast %4 : vector<40x1xf32> to vector<40x256xf32>
    %6 = arith.addf %3, %5 : vector<40x256xf32>
    %cst_6 = arith.constant 0.000000e+00 : f32
    %7 = vector.broadcast %cst_6 : f32 to vector<40x256xf32>
    %8 = arith.maximumf %6, %7 : vector<40x256xf32>
    %9 = vector.extract_strided_slice %8 {offsets = [0, 0], sizes = [8, 256], strides = [1, 1]} : vector<40x256xf32> to vector<8x256xf32>
    %10 = vector.extract_strided_slice %8 {offsets = [8, 0], sizes = [32, 256], strides = [1, 1]} : vector<40x256xf32> to vector<32x256xf32>
    %11 = arith.truncf %9 : vector<8x256xf32> to vector<8x256xbf16>
    %12 = arith.truncf %10 : vector<32x256xf32> to vector<32x256xbf16>
    %c0_7 = arith.constant 0 : index
    %c0_8 = arith.constant 0 : index
    %13 = vector.load %arg5[%c0_7, %c0_8] : memref<4x8xbf16, #tpu.memory_space<vmem>>, vector<4x8xbf16>
    %cst_9 = arith.constant dense<0.000000e+00> : vector<4x256xf32>
    %14 = tpu.matmul %13, %11, %cst_9 {dimension_numbers = #tpu.dot_dimension_numbers<[1], [0], [0], [1], [0, 0, 1, 1], [], []>} : vector<4x8xbf16>, vector<8x256xbf16>, vector<4x256xf32> -> vector<4x256xf32>
    %c0_10 = arith.constant 0 : index
    %c0_11 = arith.constant 0 : index
    %15 = vector.load %arg6[%c0_10, %c0_11] : memref<4x1xf32, #tpu.memory_space<vmem>>, vector<4x1xf32>
    %16 = vector.broadcast %15 : vector<4x1xf32> to vector<4x256xf32>
    %17 = arith.addf %14, %16 : vector<4x256xf32>
    %c0_i32 = arith.constant 0 : i32
    %18 = arith.cmpi eq, %arg1, %c0_i32 : i32
    %19 = arith.extui %18 : i1 to i32
    %c0_i32_12 = arith.constant 0 : i32
    %20 = arith.cmpi ne, %19, %c0_i32_12 : i32
    scf.if %20 {
      %cst_40 = arith.constant 0.000000e+00 : f32
      %58 = vector.broadcast %cst_40 : f32 to vector<8x1xf32>
      %c0_41 = arith.constant 0 : index
      %c0_42 = arith.constant 0 : index
      %59 = vector.load %arg15[%c0_41, %c0_42] : memref<8x1xf32, #tpu.memory_space<vmem>>, vector<8x1xf32>
      tpu.vector_store %arg15[%c0_41, %c0_42], %58 {strides = array<i32>} : memref<8x1xf32, #tpu.memory_space<vmem>>, vector<8x1xf32>,
      %cst_43 = arith.constant 0.000000e+00 : f32
      %60 = vector.broadcast %cst_43 : f32 to vector<32x1xf32>
      %c0_44 = arith.constant 0 : index
      %c0_45 = arith.constant 0 : index
      %61 = vector.load %arg16[%c0_44, %c0_45] : memref<32x1xf32, #tpu.memory_space<vmem>>, vector<32x1xf32>
      tpu.vector_store %arg16[%c0_44, %c0_45], %60 {strides = array<i32>} : memref<32x1xf32, #tpu.memory_space<vmem>>, vector<32x1xf32>,
      %cst_46 = arith.constant 0xFF800000 : f32
      %62 = vector.broadcast %cst_46 : f32 to vector<4x1xf32>
      %c0_47 = arith.constant 0 : index
      %c0_48 = arith.constant 0 : index
      %63 = vector.load %arg17[%c0_47, %c0_48] : memref<4x1xf32, #tpu.memory_space<vmem>>, vector<4x1xf32>
      tpu.vector_store %arg17[%c0_47, %c0_48], %62 {strides = array<i32>} : memref<4x1xf32, #tpu.memory_space<vmem>>, vector<4x1xf32>,
      %cst_49 = arith.constant 0.000000e+00 : f32
      %64 = vector.broadcast %cst_49 : f32 to vector<4x1xf32>
      %c0_50 = arith.constant 0 : index
      %c0_51 = arith.constant 0 : index
      %65 = vector.load %arg18[%c0_50, %c0_51] : memref<4x1xf32, #tpu.memory_space<vmem>>, vector<4x1xf32>
      tpu.vector_store %arg18[%c0_50, %c0_51], %64 {strides = array<i32>} : memref<4x1xf32, #tpu.memory_space<vmem>>, vector<4x1xf32>,
      %cst_52 = arith.constant 0.000000e+00 : f32
      %66 = vector.broadcast %cst_52 : f32 to vector<32x4xf32>
      %c0_53 = arith.constant 0 : index
      %c0_54 = arith.constant 0 : index
      %67 = vector.load %arg19[%c0_53, %c0_54] : memref<32x4xf32, #tpu.memory_space<vmem>>, vector<32x4xf32>
      tpu.vector_store %arg19[%c0_53, %c0_54], %66 {strides = array<i32>} : memref<32x4xf32, #tpu.memory_space<vmem>>, vector<32x4xf32>,
    } else {
    }
    %c0_13 = arith.constant 0 : index
    %c0_14 = arith.constant 0 : index
    %21 = vector.load %arg15[%c0_13, %c0_14] : memref<8x1xf32, #tpu.memory_space<vmem>>, vector<8x1xf32>
    %cst_15 = arith.constant dense<0.000000e+00> : vector<8xf32>
    %22 = vector.multi_reduction <add>, %9, %cst_15 [1] : vector<8x256xf32> to vector<8xf32>
    %23 = vector.shape_cast %22 : vector<8xf32> to vector<8x1xf32>
    %24 = arith.addf %21, %23 : vector<8x1xf32>
    %c0_16 = arith.constant 0 : index
    %c0_17 = arith.constant 0 : index
    %25 = vector.load %arg15[%c0_16, %c0_17] : memref<8x1xf32, #tpu.memory_space<vmem>>, vector<8x1xf32>
    tpu.vector_store %arg15[%c0_16, %c0_17], %24 {strides = array<i32>} : memref<8x1xf32, #tpu.memory_space<vmem>>, vector<8x1xf32>,
    %c0_18 = arith.constant 0 : index
    %c0_19 = arith.constant 0 : index
    %26 = vector.load %arg16[%c0_18, %c0_19] : memref<32x1xf32, #tpu.memory_space<vmem>>, vector<32x1xf32>
    %cst_20 = arith.constant dense<0.000000e+00> : vector<32xf32>
    %27 = vector.multi_reduction <add>, %10, %cst_20 [1] : vector<32x256xf32> to vector<32xf32>
    %28 = vector.shape_cast %27 : vector<32xf32> to vector<32x1xf32>
    %29 = arith.addf %26, %28 : vector<32x1xf32>
    %c0_21 = arith.constant 0 : index
    %c0_22 = arith.constant 0 : index
    %30 = vector.load %arg16[%c0_21, %c0_22] : memref<32x1xf32, #tpu.memory_space<vmem>>, vector<32x1xf32>
    tpu.vector_store %arg16[%c0_21, %c0_22], %29 {strides = array<i32>} : memref<32x1xf32, #tpu.memory_space<vmem>>, vector<32x1xf32>,
    %c0_23 = arith.constant 0 : index
    %c0_24 = arith.constant 0 : index
    %31 = vector.load %arg17[%c0_23, %c0_24] : memref<4x1xf32, #tpu.memory_space<vmem>>, vector<4x1xf32>
    %cst_25 = arith.constant dense<0xFF800000> : vector<4xf32>
    %32 = vector.multi_reduction <maximumf>, %17, %cst_25 [1] : vector<4x256xf32> to vector<4xf32>
    %33 = vector.shape_cast %32 : vector<4xf32> to vector<4x1xf32>
    %34 = arith.maximumf %31, %33 : vector<4x1xf32>
    %35 = arith.subf %31, %34 : vector<4x1xf32>
    %36 = math.exp %35 : vector<4x1xf32>
    %37 = vector.broadcast %34 : vector<4x1xf32> to vector<4x256xf32>
    %38 = arith.subf %17, %37 : vector<4x256xf32>
    %39 = math.exp %38 : vector<4x256xf32>
    %c0_26 = arith.constant 0 : index
    %c0_27 = arith.constant 0 : index
    %40 = vector.load %arg18[%c0_26, %c0_27] : memref<4x1xf32, #tpu.memory_space<vmem>>, vector<4x1xf32>
    %41 = arith.mulf %36, %40 : vector<4x1xf32>
    %cst_28 = arith.constant dense<0.000000e+00> : vector<4xf32>
    %42 = vector.multi_reduction <add>, %39, %cst_28 [1] : vector<4x256xf32> to vector<4xf32>
    %43 = vector.shape_cast %42 : vector<4xf32> to vector<4x1xf32>
    %44 = arith.addf %41, %43 : vector<4x1xf32>
    %c0_29 = arith.constant 0 : index
    %c0_30 = arith.constant 0 : index
    %45 = vector.load %arg18[%c0_29, %c0_30] : memref<4x1xf32, #tpu.memory_space<vmem>>, vector<4x1xf32>
    tpu.vector_store %arg18[%c0_29, %c0_30], %44 {strides = array<i32>} : memref<4x1xf32, #tpu.memory_space<vmem>>, vector<4x1xf32>,
    %46 = arith.truncf %39 : vector<4x256xf32> to vector<4x256xbf16>
    %cst_31 = arith.constant dense<0.000000e+00> : vector<32x4xf32>
    %47 = tpu.matmul %12, %46, %cst_31 {dimension_numbers = #tpu.dot_dimension_numbers<[1], [1], [0], [0], [0, 0, 1, 0], [], []>} : vector<32x256xbf16>, vector<4x256xbf16>, vector<32x4xf32> -> vector<32x4xf32>
    %48 = tpu.transpose %36, [1, 0] : vector<4x1xf32> -> vector<1x4xf32>
    %c0_32 = arith.constant 0 : index
    %c0_33 = arith.constant 0 : index
    %49 = vector.load %arg19[%c0_32, %c0_33] : memref<32x4xf32, #tpu.memory_space<vmem>>, vector<32x4xf32>
    %50 = vector.broadcast %48 : vector<1x4xf32> to vector<32x4xf32>
    %51 = arith.mulf %50, %49 : vector<32x4xf32>
    %52 = arith.addf %51, %47 : vector<32x4xf32>
    %c0_34 = arith.constant 0 : index
    %c0_35 = arith.constant 0 : index
    %53 = vector.load %arg19[%c0_34, %c0_35] : memref<32x4xf32, #tpu.memory_space<vmem>>, vector<32x4xf32>
    tpu.vector_store %arg19[%c0_34, %c0_35], %52 {strides = array<i32>} : memref<32x4xf32, #tpu.memory_space<vmem>>, vector<32x4xf32>,
    %c0_36 = arith.constant 0 : index
    %c0_37 = arith.constant 0 : index
    %54 = vector.load %arg17[%c0_36, %c0_37] : memref<4x1xf32, #tpu.memory_space<vmem>>, vector<4x1xf32>
    tpu.vector_store %arg17[%c0_36, %c0_37], %34 {strides = array<i32>} : memref<4x1xf32, #tpu.memory_space<vmem>>, vector<4x1xf32>,
    %c0_i32_38 = arith.constant 0 : i32
    %55 = arith.cmpi eq, %arg1, %c0_i32_38 : i32
    %56 = arith.extui %55 : i1 to i32
    %c0_i32_39 = arith.constant 0 : i32
    %57 = arith.cmpi ne, %56, %c0_i32_39 : i32
    scf.if %57 {
      %c0_40 = arith.constant 0 : index
      %c0_41 = arith.constant 0 : index
      %58 = vector.load %arg15[%c0_40, %c0_41] : memref<8x1xf32, #tpu.memory_space<vmem>>, vector<8x1xf32>
      %cst_42 = arith.constant 3.906250e-03 : f32
      %59 = vector.broadcast %cst_42 : f32 to vector<8x1xf32>
      %60 = arith.mulf %58, %59 : vector<8x1xf32>
      %c0_43 = arith.constant 0 : index
      %c0_44 = arith.constant 0 : index
      %61 = vector.load %arg7[%c0_43, %c0_44] : memref<4x8xf32, #tpu.memory_space<vmem>>, vector<4x8xf32>
      %c0_45 = arith.constant 0 : index
      %c0_46 = arith.constant 0 : index
      %62 = vector.load %arg8[%c0_45, %c0_46] : memref<4x1xf32, #tpu.memory_space<vmem>>, vector<4x1xf32>
      %63 = vector.extract_strided_slice %61 {offsets = [0, 0], sizes = [4, 1], strides = [1, 1]} : vector<4x8xf32> to vector<4x1xf32>
      %64 = vector.extract_strided_slice %60 {offsets = [0, 0], sizes = [1, 1], strides = [1, 1]} : vector<8x1xf32> to vector<1x1xf32>
      %65 = vector.broadcast %64 : vector<1x1xf32> to vector<4x1xf32>
      %66 = arith.mulf %63, %65 : vector<4x1xf32>
      %67 = arith.addf %62, %66 : vector<4x1xf32>
      %68 = vector.extract_strided_slice %61 {offsets = [0, 1], sizes = [4, 1], strides = [1, 1]} : vector<4x8xf32> to vector<4x1xf32>
      %69 = vector.extract_strided_slice %60 {offsets = [1, 0], sizes = [1, 1], strides = [1, 1]} : vector<8x1xf32> to vector<1x1xf32>
      %70 = vector.broadcast %69 : vector<1x1xf32> to vector<4x1xf32>
      %71 = arith.mulf %68, %70 : vector<4x1xf32>
      %72 = arith.addf %67, %71 : vector<4x1xf32>
      %73 = vector.extract_strided_slice %61 {offsets = [0, 2], sizes = [4, 1], strides = [1, 1]} : vector<4x8xf32> to vector<4x1xf32>
      %74 = vector.extract_strided_slice %60 {offsets = [2, 0], sizes = [1, 1], strides = [1, 1]} : vector<8x1xf32> to vector<1x1xf32>
      %75 = vector.broadcast %74 : vector<1x1xf32> to vector<4x1xf32>
      %76 = arith.mulf %73, %75 : vector<4x1xf32>
      %77 = arith.addf %72, %76 : vector<4x1xf32>
      %78 = vector.extract_strided_slice %61 {offsets = [0, 3], sizes = [4, 1], strides = [1, 1]} : vector<4x8xf32> to vector<4x1xf32>
      %79 = vector.extract_strided_slice %60 {offsets = [3, 0], sizes = [1, 1], strides = [1, 1]} : vector<8x1xf32> to vector<1x1xf32>
      %80 = vector.broadcast %79 : vector<1x1xf32> to vector<4x1xf32>
      %81 = arith.mulf %78, %80 : vector<4x1xf32>
      %82 = arith.addf %77, %81 : vector<4x1xf32>
      %83 = vector.extract_strided_slice %61 {offsets = [0, 4], sizes = [4, 1], strides = [1, 1]} : vector<4x8xf32> to vector<4x1xf32>
      %84 = vector.extract_strided_slice %60 {offsets = [4, 0], sizes = [1, 1], strides = [1, 1]} : vector<8x1xf32> to vector<1x1xf32>
      %85 = vector.broadcast %84 : vector<1x1xf32> to vector<4x1xf32>
      %86 = arith.mulf %83, %85 : vector<4x1xf32>
      %87 = arith.addf %82, %86 : vector<4x1xf32>
      %88 = vector.extract_strided_slice %61 {offsets = [0, 5], sizes = [4, 1], strides = [1, 1]} : vector<4x8xf32> to vector<4x1xf32>
      %89 = vector.extract_strided_slice %60 {offsets = [5, 0], sizes = [1, 1], strides = [1, 1]} : vector<8x1xf32> to vector<1x1xf32>
      %90 = vector.broadcast %89 : vector<1x1xf32> to vector<4x1xf32>
      %91 = arith.mulf %88, %90 : vector<4x1xf32>
      %92 = arith.addf %87, %91 : vector<4x1xf32>
      %93 = vector.extract_strided_slice %61 {offsets = [0, 6], sizes = [4, 1], strides = [1, 1]} : vector<4x8xf32> to vector<4x1xf32>
      %94 = vector.extract_strided_slice %60 {offsets = [6, 0], sizes = [1, 1], strides = [1, 1]} : vector<8x1xf32> to vector<1x1xf32>
      %95 = vector.broadcast %94 : vector<1x1xf32> to vector<4x1xf32>
      %96 = arith.mulf %93, %95 : vector<4x1xf32>
      %97 = arith.addf %92, %96 : vector<4x1xf32>
      %98 = vector.extract_strided_slice %61 {offsets = [0, 7], sizes = [4, 1], strides = [1, 1]} : vector<4x8xf32> to vector<4x1xf32>
      %99 = vector.extract_strided_slice %60 {offsets = [7, 0], sizes = [1, 1], strides = [1, 1]} : vector<8x1xf32> to vector<1x1xf32>
      %100 = vector.broadcast %99 : vector<1x1xf32> to vector<4x1xf32>
      %101 = arith.mulf %98, %100 : vector<4x1xf32>
      %102 = arith.addf %97, %101 : vector<4x1xf32>
      %cst_47 = arith.constant 0.000000e+00 : f32
      %103 = vector.broadcast %cst_47 : f32 to vector<4x1xf32>
      %104 = arith.subf %103, %102 : vector<4x1xf32>
      %105 = math.exp %104 : vector<4x1xf32>
      %cst_48 = arith.constant 1.000000e+00 : f32
      %106 = vector.broadcast %cst_48 : f32 to vector<4x1xf32>
      %107 = arith.addf %106, %105 : vector<4x1xf32>
      %cst_49 = arith.constant 1.000000e+00 : f32
      %108 = vector.broadcast %cst_49 : f32 to vector<4x1xf32>
      %109 = arith.divf %108, %107 : vector<4x1xf32>
      %c0_50 = arith.constant 0 : index
      %c0_51 = arith.constant 0 : index
      %110 = vector.load %arg18[%c0_50, %c0_51] : memref<4x1xf32, #tpu.memory_space<vmem>>, vector<4x1xf32>
      %111 = arith.divf %109, %110 : vector<4x1xf32>
      %c0_52 = arith.constant 0 : index
      %c0_53 = arith.constant 0 : index
      %112 = vector.load %arg19[%c0_52, %c0_53] : memref<32x4xf32, #tpu.memory_space<vmem>>, vector<32x4xf32>
      %113 = vector.extract_strided_slice %112 {offsets = [0, 0], sizes = [32, 1], strides = [1, 1]} : vector<32x4xf32> to vector<32x1xf32>
      %114 = vector.extract_strided_slice %111 {offsets = [0, 0], sizes = [1, 1], strides = [1, 1]} : vector<4x1xf32> to vector<1x1xf32>
      %115 = vector.broadcast %114 : vector<1x1xf32> to vector<32x1xf32>
      %116 = arith.mulf %113, %115 : vector<32x1xf32>
      %117 = vector.extract_strided_slice %112 {offsets = [0, 1], sizes = [32, 1], strides = [1, 1]} : vector<32x4xf32> to vector<32x1xf32>
      %118 = vector.extract_strided_slice %111 {offsets = [1, 0], sizes = [1, 1], strides = [1, 1]} : vector<4x1xf32> to vector<1x1xf32>
      %119 = vector.broadcast %118 : vector<1x1xf32> to vector<32x1xf32>
      %120 = arith.mulf %117, %119 : vector<32x1xf32>
      %121 = arith.addf %116, %120 : vector<32x1xf32>
      %122 = vector.extract_strided_slice %112 {offsets = [0, 2], sizes = [32, 1], strides = [1, 1]} : vector<32x4xf32> to vector<32x1xf32>
      %123 = vector.extract_strided_slice %111 {offsets = [2, 0], sizes = [1, 1], strides = [1, 1]} : vector<4x1xf32> to vector<1x1xf32>
      %124 = vector.broadcast %123 : vector<1x1xf32> to vector<32x1xf32>
      %125 = arith.mulf %122, %124 : vector<32x1xf32>
      %126 = arith.addf %121, %125 : vector<32x1xf32>
      %127 = vector.extract_strided_slice %112 {offsets = [0, 3], sizes = [32, 1], strides = [1, 1]} : vector<32x4xf32> to vector<32x1xf32>
      %128 = vector.extract_strided_slice %111 {offsets = [3, 0], sizes = [1, 1], strides = [1, 1]} : vector<4x1xf32> to vector<1x1xf32>
      %129 = vector.broadcast %128 : vector<1x1xf32> to vector<32x1xf32>
      %130 = arith.mulf %127, %129 : vector<32x1xf32>
      %131 = arith.addf %126, %130 : vector<32x1xf32>
      %cst_54 = arith.constant dense<0.000000e+00> : vector<1xf32>
      %132 = vector.multi_reduction <add>, %109, %cst_54 [0] : vector<4x1xf32> to vector<1xf32>
      %133 = vector.shape_cast %132 : vector<1xf32> to vector<1x1xf32>
      %cst_55 = arith.constant 9.99999997E-7 : f32
      %134 = vector.broadcast %cst_55 : f32 to vector<1x1xf32>
      %135 = arith.addf %133, %134 : vector<1x1xf32>
      %136 = vector.broadcast %135 : vector<1x1xf32> to vector<32x1xf32>
      %137 = arith.divf %131, %136 : vector<32x1xf32>
      %c0_56 = arith.constant 0 : index
      %c0_57 = arith.constant 0 : index
      %138 = vector.load %arg16[%c0_56, %c0_57] : memref<32x1xf32, #tpu.memory_space<vmem>>, vector<32x1xf32>
      %cst_58 = arith.constant 3.906250e-03 : f32
      %139 = vector.broadcast %cst_58 : f32 to vector<32x1xf32>
      %140 = arith.mulf %138, %139 : vector<32x1xf32>
      %141 = tpu.transpose %140, [1, 0] : vector<32x1xf32> -> vector<1x32xf32>
      %142 = tpu.transpose %137, [1, 0] : vector<32x1xf32> -> vector<1x32xf32>
      %c0_59 = arith.constant 0 : index
      %c0_60 = arith.constant 0 : index
      %143 = vector.load %arg9[%c0_59, %c0_60] : memref<32x32xf32, #tpu.memory_space<vmem>>, vector<32x32xf32>
      %cst_61 = arith.constant dense<0.000000e+00> : vector<1x32xf32>
      %144 = tpu.matmul %141, %143, %cst_61 {dimension_numbers = #tpu.dot_dimension_numbers<[1], [0], [0], [1], [0, 0, 1, 1], [], []>} : vector<1x32xf32>, vector<32x32xf32>, vector<1x32xf32> -> vector<1x32xf32>
      %c0_62 = arith.constant 0 : index
      %c0_63 = arith.constant 0 : index
      %145 = vector.load %arg10[%c0_62, %c0_63] : memref<1x32xf32, #tpu.memory_space<vmem>>, vector<1x32xf32>
      %146 = arith.addf %144, %145 : vector<1x32xf32>
      %c0_64 = arith.constant 0 : index
      %c0_65 = arith.constant 0 : index
      %c0_66 = arith.constant 0 : index
      %147 = vector.load %arg13[%c0_64, %c0_65, %c0_66] : memref<1x1x32xf32, #tpu.memory_space<vmem>>, vector<1x1x32xf32>
      %148 = vector.shape_cast %147 : vector<1x1x32xf32> to vector<1x32xf32>
      %149 = vector.shape_cast %146 : vector<1x32xf32> to vector<1x1x32xf32>
      tpu.vector_store %arg13[%c0_64, %c0_65, %c0_66], %149 {strides = array<i32>} : memref<1x1x32xf32, #tpu.memory_space<vmem>>, vector<1x1x32xf32>,
      %c0_67 = arith.constant 0 : index
      %c0_68 = arith.constant 0 : index
      %150 = vector.load %arg11[%c0_67, %c0_68] : memref<32x32xf32, #tpu.memory_space<vmem>>, vector<32x32xf32>
      %cst_69 = arith.constant dense<0.000000e+00> : vector<1x32xf32>
      %151 = tpu.matmul %142, %150, %cst_69 {dimension_numbers = #tpu.dot_dimension_numbers<[1], [0], [0], [1], [0, 0, 1, 1], [], []>} : vector<1x32xf32>, vector<32x32xf32>, vector<1x32xf32> -> vector<1x32xf32>
      %c0_70 = arith.constant 0 : index
      %c0_71 = arith.constant 0 : index
      %152 = vector.load %arg12[%c0_70, %c0_71] : memref<1x32xf32, #tpu.memory_space<vmem>>, vector<1x32xf32>
      %153 = arith.addf %151, %152 : vector<1x32xf32>
      %c0_72 = arith.constant 0 : index
      %c0_73 = arith.constant 0 : index
      %c0_74 = arith.constant 0 : index
      %154 = vector.load %arg14[%c0_72, %c0_73, %c0_74] : memref<1x1x32xf32, #tpu.memory_space<vmem>>, vector<1x1x32xf32>
      %155 = vector.shape_cast %154 : vector<1x1x32xf32> to vector<1x32xf32>
      %156 = vector.shape_cast %153 : vector<1x32xf32> to vector<1x1x32xf32>
      tpu.vector_store %arg14[%c0_72, %c0_73, %c0_74], %156 {strides = array<i32>} : memref<1x1x32xf32, #tpu.memory_space<vmem>>, vector<1x1x32xf32>,
    } else {
    }
    return
  }
  func.func @transform_0(%arg0: i32, %arg1: i32) -> (i32, i32, i32) {
    %c0_i32 = arith.constant 0 : i32
    %c0_i32_0 = arith.constant 0 : i32
    return %arg0, %c0_i32, %arg1 : i32, i32, i32
  }
  func.func @transform_1(%arg0: i32, %arg1: i32) -> (i32, i32) {
    %c0_i32 = arith.constant 0 : i32
    %c0_i32_0 = arith.constant 0 : i32
    %c0_i32_1 = arith.constant 0 : i32
    return %c0_i32, %c0_i32_0 : i32, i32
  }
  func.func @transform_2(%arg0: i32, %arg1: i32) -> (i32, i32) {
    %c0_i32 = arith.constant 0 : i32
    %c0_i32_0 = arith.constant 0 : i32
    %c0_i32_1 = arith.constant 0 : i32
    return %c0_i32, %c0_i32_0 : i32, i32
  }
  func.func @transform_3(%arg0: i32, %arg1: i32) -> (i32, i32) {
    %c0_i32 = arith.constant 0 : i32
    %c0_i32_0 = arith.constant 0 : i32
    %c0_i32_1 = arith.constant 0 : i32
    return %c0_i32, %c0_i32_0 : i32, i32
  }
  func.func @transform_4(%arg0: i32, %arg1: i32) -> (i32, i32) {
    %c0_i32 = arith.constant 0 : i32
    %c0_i32_0 = arith.constant 0 : i32
    %c0_i32_1 = arith.constant 0 : i32
    return %c0_i32, %c0_i32_0 : i32, i32
  }
  func.func @transform_5(%arg0: i32, %arg1: i32) -> (i32, i32) {
    %c0_i32 = arith.constant 0 : i32
    %c0_i32_0 = arith.constant 0 : i32
    %c0_i32_1 = arith.constant 0 : i32
    return %c0_i32, %c0_i32_0 : i32, i32
  }
  func.func @transform_6(%arg0: i32, %arg1: i32) -> (i32, i32) {
    %c0_i32 = arith.constant 0 : i32
    %c0_i32_0 = arith.constant 0 : i32
    %c0_i32_1 = arith.constant 0 : i32
    return %c0_i32, %c0_i32_0 : i32, i32
  }
  func.func @transform_7(%arg0: i32, %arg1: i32) -> (i32, i32) {
    %c0_i32 = arith.constant 0 : i32
    %c0_i32_0 = arith.constant 0 : i32
    %c0_i32_1 = arith.constant 0 : i32
    return %c0_i32, %c0_i32_0 : i32, i32
  }
  func.func @transform_8(%arg0: i32, %arg1: i32) -> (i32, i32) {
    %c0_i32 = arith.constant 0 : i32
    %c0_i32_0 = arith.constant 0 : i32
    %c0_i32_1 = arith.constant 0 : i32
    return %c0_i32, %c0_i32_0 : i32, i32
  }
  func.func @transform_9(%arg0: i32, %arg1: i32) -> (i32, i32) {
    %c0_i32 = arith.constant 0 : i32
    %c0_i32_0 = arith.constant 0 : i32
    %c0_i32_1 = arith.constant 0 : i32
    return %c0_i32, %c0_i32_0 : i32, i32
  }
  func.func @transform_10(%arg0: i32, %arg1: i32) -> (i32, i32) {
    %c0_i32 = arith.constant 0 : i32
    %c0_i32_0 = arith.constant 0 : i32
    %c0_i32_1 = arith.constant 0 : i32
    return %c0_i32, %c0_i32_0 : i32, i32
  }
  func.func @transform_11(%arg0: i32, %arg1: i32) -> (i32, i32, i32) {
    %c0_i32 = arith.constant 0 : i32
    %c0_i32_0 = arith.constant 0 : i32
    %c0_i32_1 = arith.constant 0 : i32
    return %arg0, %c0_i32, %c0_i32_0 : i32, i32, i32
  }
  func.func @transform_12(%arg0: i32, %arg1: i32) -> (i32, i32, i32) {
    %c0_i32 = arith.constant 0 : i32
    %c0_i32_0 = arith.constant 0 : i32
    %c0_i32_1 = arith.constant 0 : i32
    return %arg0, %c0_i32, %c0_i32_0 : i32, i32, i32
  }
}

</mosaic_0001>

<bundles_post_ra>
// kernel: pose_baseline_forward.1
= control target key start
LH: loop header
LB: loop body
LE: loop exit
PB: predicated region body
PF: predicated region fallthrough
CT: control target
= control target key end

     0   :  { %s2190_s0 = inlined_call_operand.vmem [shape: bf16[2,3,256], index: 0, kind: input, shape index: {}]   ;;  %s2191_s1 = inlined_call_operand.vmem [shape: bf16[40,3], index: 1, kind: input, shape index: {}]   ;;  %s2192_s2 = inlined_call_operand.vmem [shape: f32[40,1], index: 2, kind: input, shape index: {}]   ;;  %s2193_s3 = inlined_call_operand.vmem [shape: bf16[4,8], index: 3, kind: input, shape index: {}]   ;;  %s2194_s4 = inlined_call_operand.vmem [shape: f32[4,1], index: 4, kind: input, shape index: {}]   ;;  %s2195_s5 = inlined_call_operand.vmem [shape: f32[4,8], index: 5, kind: input, shape index: {}]   ;;  %s2196_s6 = inlined_call_operand.vmem [shape: f32[4,1], index: 6, kind: input, shape index: {}]   ;;  %s2197_s7 = inlined_call_operand.vmem [shape: f32[32,32], index: 7, kind: input, shape index: {}]   ;;  %s2198_s8 = inlined_call_operand.vmem [shape: f32[1,32], index: 8, kind: input, shape index: {}]   ;;  %s2199_s9 = inlined_call_operand.vmem [shape: f32[32,32], index: 9, kind: input, shape index: {}]   ;;  %s2200_s10 = inlined_call_operand.vmem [shape: f32[1,32], index: 10, kind: input, shape index: {}]   ;;  %s2201_s11 = inlined_call_operand.hbm [shape: f32[2,1,32], index: 11, kind: output, shape index: {0}]   ;;  %s2202_s12 = inlined_call_operand.hbm [shape: f32[2,1,32], index: 12, kind: output, shape index: {1}]  }
   0x1   :  { %2207 = sst [smem:[#allocation14_spill]] %s2190_s0 }
   0x2   :  { %2208 = sst [smem:[#allocation15_spill]] %s2191_s1 }
   0x3   :  { %2209 = sst [smem:[#allocation16_spill]] %s2192_s2 }
   0x4   :  { %18 = vsyncpa [#allocation8], 0 }
   0x5   :  { %20 = vsyncpa [#allocation8 + $0x1], 0 }
   0x6   :  { %21 = vsyncpa [#allocation10], 0 }
   0x7   :  { %23 = vsyncpa [#allocation10 + $0x1], 0  ;;  %s1814_s21 = smov 0   ;;  %s1816_s22 = smov 0  }
   0x8   :  { %s1818_s23 = smov 0   ;;  %s1820_s24 = smov 0  }
   0x9   :  { %s1822_s25 = smov 0   ;;  %s1824_s26 = smov 0  }
   0xa LB: > { %s1449_s27 = sadd.s32 4294967295, %s1725_s26   ;;  %s1450_s28 = sadd.s32 4294967294, %s1725_s26   ;;  %s1725_s26 = sphi %s1824_s26, %s29_s26   ;;  %s1721_s25 = sphi %s1822_s25, %s2224_s25   ;;  %s1717_s24 = sphi %s1820_s24, %s2223_s24   ;;  %s1713_s23 = sphi %s1818_s23, %s2222_s23   ;;  %s1709_s22 = sphi %s1816_s22, %s2221_s22   ;;  %s1705_s21 = sphi %s1814_s21, %s2220_s21  }
   0xb   : > { %s41_s29 = sadd.s32 1, %s1721_s25  ;;  %s286_s30 = sadd.s32 1, %s1713_s23 }
   0xc   : > { %p43_p0 = scmp.ge.s32.totalorder %s41_s29, 2  ;;  %p296_p1 = scmp.ne.s32.totalorder %s1713_s23, %s1709_s22 }
   0xd   : > { %p297_p2 = scmp.eq.s32.totalorder %s1449_s27, 1  ;;  %p302_p3 = scmp.ne.s32.totalorder %s1709_s22, %s1705_s21 }
   0xe   : > { %s2226_s29 = smov (%p43_p0, %s41_s29), 0  ;;  %p303_p5 = scmp.eq.s32.totalorder %s1450_s28, 1 }
   0xf   : > { %2210 = sst [smem:[#allocation13_spill]] %s2226_s29  ;;  %p1854_p4 = por %p297_p2, %p296_p1 }
  0x10   : > { %s283_s14 = ssub.s32 %s1721_s25, %s2226_s29  ;;  %p1453_p6 = scmp.ge.s32.totalorder %s1725_s26, 1 }
  0x11   : > { %p284_p7 = scmp.eq.s32.totalorder %s283_s14, 0  ;;  %p1861_p8 = por %p303_p5, %p302_p3 }
  0x12   : > { %p390_p9 = scmp.lt.s32.totalorder %s1725_s26, 3 }
  0x13   : > { %s1867_s16 = scalar_select %p284_p7, %s1713_s23, %s286_s30  }
  0x14   : > { %p391_p10 = pnand %p1453_p6, %p390_p9 }
  0x15   : > { %p440_p11 = scmp.lt.s32.totalorder (!%p391_p10), %s1717_s24, 1  ;;  %vm518_vm0 = vcmask (!%p391_p10), 1040384   ;;  %v1727_v0 = vmov (!%p391_p10), 0   ;;  %vm519_vm1 = vcmask (!%p391_p10), 1041408   ;;  %v1728_v1 = vmov (!%p391_p10), 65535   ;;  %s2213_s2 = sld [smem:[#allocation16_spill]] (!%p391_p10) }
  0x16   : > { %394 = sbr.rel (%p391_p10) target bundleno = 1673 (0x689), region = 64  ;;  %560 = vmatprep.mubr.bf16.mxu0 (!%p391_p10), %v1727_v0  ;;  %1596 = vset.pattern.permute.xlu0 (!%p391_p10), %v1727_v0  ;;  %v520_v2 = vsel (!%p391_p10), %vm518_vm0, 4294967295, %v1728_v1  ;;  %v606_v4 = vld [vmem:[%s2194_s4] sm:$0xf] (!%p391_p10)  ;;  %s2214_s0 = sld [smem:[#allocation14_spill]] (!%p391_p10)  ;;  %vm508_vm2 = vcmask (!%p391_p10), 23552   ;;  %v831_v30 = vlaneseq (!%p391_p10) }
  0x17   : > { %655 = vmatprep.mubr.bf16.mxu1 (!%p391_p10), %v1727_v0  ;;  %1597 = vset.pattern.permute.xlu1 (!%p391_p10), %v1727_v0  ;;  %v521_v5 = vsel (!%p391_p10), %vm519_vm1, %v520_v2, 0  ;;  %s2215_s1 = sld [smem:[#allocation15_spill]] (!%p391_p10)  ;;  %vm668_vm3 = vcmask (!%p391_p10), 7168   ;;  %v1729_v11 = vmov (!%p391_p10), 0.0   ;;  %vm616_vm4 = vcmask (!%p391_p10), 1043456   ;;  %s2204_s14 = smov (!%p391_p10), 2  }
  0x18   : > { %669 = vst.msk [vmem:[#allocation2] sm:$0xff] (!%p391_p10), %vm668_vm3, %v1729_v11  ;;  %670 = vst.msk [vmem:[#allocation3] sm:$0xff] (!%p391_p10), %vm668_vm3, %v1729_v11  ;;  %v605_v25 = vld [vmem:[%s2193_s3] sm:$0x3] (!%p391_p10)  ;;  %vm612_vm5 = vcmask (!%p391_p10), 64512   ;;  %vm674_vm6 = vcmask (!%p391_p10), 3072  }
  0x19   : > { %671 = vst.msk [vmem:[#allocation3 + $0x8] sm:$0xff] (!%p391_p10), %vm668_vm3, %v1729_v11  ;;  %672 = vst.msk [vmem:[#allocation3 + $0x10] sm:$0xff] (!%p391_p10), %vm668_vm3, %v1729_v11  ;;  %v1730_v32 = vmov (!%p391_p10), -inf   ;;  %v1916_v33 = vshrl.u32 (!%p391_p10), %v831_v30, 7  ;;  %s1732_s18 = smov (!%p391_p10), 1   ;;  %s1733_s19 = smov (!%p391_p10), 3  }
  0x1a   : > { %673 = vst.msk [vmem:[#allocation3 + $0x18] sm:$0xff] (!%p391_p10), %vm668_vm3, %v1729_v11  ;;  %s1737_s27 = smov (!%p391_p10), 7   ;;  %s1743_s28 = smov (!%p391_p10), 122   ;;  %vm677_vm7 = vcmask (!%p391_p10), 31744   ;;  %vm1746_vm8 = vmmov (!%p391_p10), 0   ;;  %vm1167_vm9 = vcmask (!%p391_p10), 261120  }
  0x1b   : > { %v456_v3 = vld [vmem:[%s2213_s2] sm:$0xff] (!%p391_p10)  ;;  %675 = vst.msk [vmem:[#allocation4] sm:$0xf] (!%p391_p10), %vm674_vm6, %v1730_v32  ;;  %676 = vst.msk [vmem:[#allocation5] sm:$0xf] (!%p391_p10), %vm674_vm6, %v1729_v11  ;;  %v878_v35 = vsub.s32 (!%p391_p10), 2, %v1916_v33 }
  0x1c   : > { %463 = vperm.xlu0 (!%p391_p10), %1596, %v456_v3   ;;  %v906_v36 = vsub.s32 (!%p391_p10), 4, %v1916_v33  ;;  %v920_v38 = vsub.s32 (!%p391_p10), 5, %v1916_v33  ;;  %v934_v39 = vsub.s32 (!%p391_p10), 6, %v1916_v33  ;;  %v948_v40 = vsub.s32 (!%p391_p10), 7, %v1916_v33  ;;  %v457_v60 = vld [vmem:[%s2213_s2 + $0x8] sm:$0xff] (!%p391_p10)  ;;  %v458_v61 = vld [vmem:[%s2213_s2 + $0x10] sm:$0xff] (!%p391_p10) }
  0x1d   : > { %s441_s17 = scalar_select %p440_p11, %s1717_s24, 1  ;;  %v1598_v10 = vld [vmem:[%s2215_s1] sm:$0xff]   ;;  %v1599_v31 = vld [vmem:[%s2215_s1 + $0x8] sm:$0xff]   ;;  %v1600_v34 = vld [vmem:[%s2215_s1 + $0x10] ss:$0 sps:$4 sm:$0xff]   ;;  %678 = vst.msk [vmem:[#allocation6] sm:$0xff] %vm677_vm7, %v1729_v11 }
  0x1e   : > { %v460_v3 = vld [vmem:[%s2213_s2 + $0x20] sm:$0xff]  ;;  %s1744_s30 = smov 121   ;;  %679 = vst.msk [vmem:[#allocation6 + $0x8] sm:$0xff] %vm677_vm7, %v1729_v11  ;;  %680 = vst.msk [vmem:[#allocation6 + $0x10] sm:$0xff] %vm677_vm7, %v1729_v11  ;;  %vm1241_vm10 = vcmask 253952  }
  0x1f   : > { %s1471_s20 = sshll.u32 %s441_s17, 2  ;;  %v682_v27 = vld [vmem:[#allocation2] sm:$0xff]  ;;  %s1735_s17 = smov 5   ;;  %681 = vst.msk [vmem:[#allocation6 + $0x18] sm:$0xff] %vm677_vm7, %v1729_v11 }
  0x20   : > { %s447_s29 = scalar_lea.vmem %s2214_s0, %s1471_s20  ;;  %609 = vperm.xlu0 %1596, %v606_v4   ;;  %v864_v4 = vsub.s32 1, %v1916_v33  ;;  %s1736_s20 = smov 6  }
  0x21   : > { %v1459_v6 = vld.sshfl [vmem:[%s447_s29] sm:$0x33 pattern:$0x76325410]  ;;  %s1734_s29 = smov 4   ;;  %s2217_s0 = smov 125  }
  0x22   : > { %v507_v7 = vcombine.high %v1459_v6, %v1459_v6  ;;  %v523_v8 = vand.u32 %v1459_v6, %v521_v5  ;;  %v1940_v56 = vld [vmem:[#allocation4] sm:$0xf] }
  0x24   : > { %v526_v9 = vand.u32 %v521_v5, %v507_v7 }
  0x26   : > { %528 = vmatprep.subr.bf16.mxu0 %v526_v9 }
  0x27   : > { %529 = vmatpush1.bf16.msra.mxu0 %v523_v8 }
  0x2a   : > { %1460 = vmatmul.mubr.msk.bf16.vlgmr.msra.gmra.mrb[0].mxu0 %vm508_vm2, %v1598_v10  ;;  %v892_v10 = vsub.s32 3, %v1916_v33 }
  0x2b   : > { %570 = vmatprep.mubr.bf16.mxu0 %v1727_v0 }
  0x32   : > { %1461 = vmatmul.mubr.msk.bf16.gmra.mrb[4].mxu0 %vm508_vm2, %v1599_v31 }
  0x33   : > { %580 = vmatprep.mubr.bf16.mxu0 %v1727_v0  ;;  %v459_v0 = vld [vmem:[%s2213_s2 + $0x18] sm:$0xff] }
  0x3a   : > { %1462 = vmatmul.mubr.msk.bf16.gmra.mrb[8].mxu0 %vm508_vm2, %v1600_v34 }
  0x3b   : > { %1490 = vmatprep.mubr.msk.f32.mxu0 %vm1746_vm8, %v1729_v11 }
  0x9b   : > { %v464_v12 = vpop.permute.xlu0 %463 }
  0x9f   : > { %v610_v26 = vpop.permute.xlu0 %609 }
  0xfd   : > { %v562_v13 = vpop.f32.mrb[0].mxu0 }
  0xfe   : > { %v563_v14 = vadd.f32 %v562_v13, %v464_v12  ;;  %v564_v15 = vpop.f32.mrb[1].mxu0 }
  0xff   : > { %v565_v16 = vadd.f32 %v564_v15, %v464_v12  ;;  %v1899_v17 = vpop.f32.mrb[2].mxu0 }
 0x100   : > { %v589_v18 = vmax.f32 %v563_v14, 0.0  ;;  %v1901_v19 = vpop.f32.mrb[3].mxu0  ;;  %v1975_v14 = vld [vmem:[%s2195_s5] sm:$0xf] }
 0x101   : > { %v590_v20 = vmax.f32 %v565_v16, 0.0 }
 0x102   : > { %v599_v21 = vpack.c.bf16 %v589_v18, %v589_v18 }
 0x103   : > { %v600_v22 = vpack.c.bf16 %v590_v20, %v590_v20  ;;  %v683_v23 = vadd.f32 %v590_v20, %v589_v18 }
 0x104   : > { %v618_v24 = vsel %vm616_vm4, %v599_v21, 0 }
 0x105   : > { %1463 = vmatprep.subr.msk.bf16.mxu1 %vm616_vm4, %v600_v22  ;;  %684 = vadd.xlane.f32.xlu0 %v683_v23  ;;  %v572_v62 = vpop.f32.mrb[4].mxu0 }
 0x106   : > { %624 = vmatpush1.bf16.msra.mxu1 %v618_v24  ;;  %v574_v63 = vpop.f32.mrb[5].mxu0 }
 0x107   : > { %v576_v1 = vpop.f32.mrb[6].mxu0 }
 0x108   : > { %v578_v2 = vpop.f32.mrb[7].mxu0 }
 0x109   : > { %1464 = vmatmul.mubr.msk.bf16.vlgmr.msra.gmra.mrb[0].mxu1 %vm612_vm5, %v605_v25 }
 0x10d   : > { %v582_v5 = vpop.f32.mrb[8].mxu0 }
 0x10e   : > { %v584_v6 = vpop.f32.mrb[9].mxu0 }
 0x10f   : > { %v586_v7 = vpop.f32.mrb[10].mxu0 }
 0x110   : > { %v587_v8 = vpop.f32.mrb[11].mxu0 }
 0x192   : > { %v685_v28 = vpop.xlane.xlu0 %684 }
 0x193   : > { %v686_v29 = vadd.f32 %v685_v28, %v682_v27 }
 0x195   : > { %688 = vst.msk [vmem:[#allocation2] sm:$0xff] %vm668_vm3, %v686_v29 }
 0x19c   : > { %v852_v37 = vld [vmem:[#allocation2] sm:$0xff] }
 0x19d   : > { %v1927_v41 = vmul.f32 0.00390625, %v852_v37 }
 0x19f   : > { %v879_v42 = vrot.slane %v1927_v41, %v878_v35  ;;  %v907_v43 = vrot.slane %v1927_v41, %v906_v36  ;;  %v921_v44 = vrot.slane %v1927_v41, %v920_v38  ;;  %v935_v45 = vrot.slane %v1927_v41, %v934_v39 }
 0x1a0   : > { %v949_v46 = vrot.slane %v1927_v41, %v948_v40  ;;  %v865_v9 = vrot.slane %v1927_v41, %v864_v4  ;;  %v893_v12 = vrot.slane %v1927_v41, %v892_v10 }
 0x1a1   : > { %881 = vrot.lane.b32.xlu0 %v879_v42, %s2204_s14  ;;  %s1738_s14 = smov 126  }
 0x1dc   : > { %v657_v47 = vpop.f32.mrb[0].mxu1 }
 0x1dd   : > { %v658_v48 = vadd.f32 %v657_v47, %v610_v26  ;;  %v659_v49 = vpop.f32.mrb[1].mxu1 }
 0x1de   : > { %v660_v50 = vadd.f32 %v659_v49, %v610_v26  ;;  %v661_v51 = vpop.f32.mrb[2].mxu1 }
 0x1df   : > { %v662_v52 = vpop.f32.mrb[3].mxu1  ;;  %v714_v53 = vsel %vm616_vm4, %v658_v48, -inf }
 0x1e0   : > { %v715_v54 = vsel %vm616_vm4, %v660_v50, -inf }
 0x1e1   : > { %v716_v55 = vmax.f32 %v714_v53, %v715_v54 }
 0x1e3   : > { %717 = vmax.xlane.f32.xlu1 %v716_v55 }
 0x213   : > { %v882_v13 = vpop.permute.xlu0 %881 }
 0x214   : > { %v884_v15 = vmul.f32 %v882_v13, %v1975_v14  ;;  %v1992_v13 = vsub.s32 0, %v1916_v33  ;;  %v830_v33 = vld [vmem:[#allocation6 + $0x18] sm:$0xff] }
 0x270   : > { %v718_v57 = vpop.xlane.xlu1 %717 }
 0x271   : > { %v1943_v58 = vmax.f32 %v1940_v56, %v718_v57 }
 0x273   : > { %v720_v59 = vsub.f32 %v1940_v56, %v1943_v58  ;;  %848 = vst.msk [vmem:[#allocation4] sm:$0xf] %vm674_vm6, %v1943_v58  ;;  %725 = vperm.xlu1 %1597, %v1943_v58  }
 0x277   : > { %468 = vperm.xlu1 %1597, %v457_v60  }
 0x27b   : > { %473 = vperm.xlu1 %1597, %v458_v61  }
 0x27f   : > { %478 = vperm.xlu1 %1597, %v459_v0  }
 0x283   : > { %483 = vperm.xlu1 %1597, %v460_v3  }
 0x287   : > { %867 = vrot.lane.b32.xlu1 %v865_v9, %s1732_s18 }
 0x28b   : > { %895 = vrot.lane.b32.xlu1 %v893_v12, %s1733_s19 }
 0x28f   : > { %909 = vrot.lane.b32.xlu1 %v907_v43, %s1734_s29  ;;  %s1739_s29 = smov 127  }
 0x293   : > { %923 = vrot.lane.b32.xlu1 %v921_v44, %s1735_s17  ;;  %s2205_s17 = smov 125  }
 0x297   : > { %937 = vrot.lane.b32.xlu1 %v935_v45, %s1736_s20  ;;  %s1741_s20 = smov 124  }
 0x29b   : > { %951 = vrot.lane.b32.xlu1 %v949_v46, %s1737_s27  ;;  %s1742_s27 = smov 123  }
 0x29f   : > { %886 = vrot.lane.b32.xlu1 %v884_v15, %s1738_s14  ;;  %v859_v15 = vrot.slane %v1927_v41, %v1992_v13 }
 0x2f2   : > { %v726_v16 = vpop.permute.xlu1 %725 }
 0x2f3   : > { %v728_v18 = vsub.f32 %v658_v48, %v726_v16  ;;  %v729_v20 = vsub.f32 %v660_v50, %v726_v16 }
 0x2f5   : > { %v730_v21 = vmul.f32 1.442695, %v728_v18  ;;  %v732_v22 = vmul.f32 1.442695, %v729_v20  ;;  %v860_v18 = vmul.f32 %v859_v15, %v1975_v14  ;;  %v855_v20 = vld [vmem:[%s2196_s6] sm:$0xf] }
 0x2f6   : > { %v469_v23 = vpop.permute.xlu1 %468  ;;  %v829_v15 = vld [vmem:[#allocation6 + $0x10] sm:$0xff] }
 0x2f7   : > { %1601 = vpow2.f32 %v730_v21  ;;  %v567_v24 = vadd.f32 %v1899_v17, %v469_v23  ;;  %v569_v25 = vadd.f32 %v1901_v19, %v469_v23  ;;  %v861_v23 = vadd.f32 %v860_v18, %v855_v20 }
 0x2f8   : > { %1603 = vpow2.f32 %v732_v22 }
 0x2f9   : > { %v591_v26 = vmax.f32 %v567_v24, 0.0  ;;  %v592_v27 = vmax.f32 %v569_v25, 0.0 }
 0x2fa   : > { %v474_v28 = vpop.permute.xlu1 %473 }
 0x2fb   : > { %v573_v29 = vadd.f32 %v572_v62, %v474_v28  ;;  %v575_v30 = vadd.f32 %v574_v63, %v474_v28  ;;  %v693_v31 = vadd.f32 %v592_v27, %v591_v26 }
 0x2fd   : > { %v593_v32 = vmax.f32 %v573_v29, 0.0  ;;  %v594_v34 = vmax.f32 %v575_v30, 0.0 }
 0x2fe   : > { %v479_v36 = vpop.permute.xlu1 %478 }
 0x2ff   : > { %v601_v37 = vpack.c.bf16 %v593_v32, %v591_v26  ;;  %v577_v38 = vadd.f32 %v576_v1, %v479_v36  ;;  %v579_v39 = vadd.f32 %v578_v2, %v479_v36  ;;  %v602_v40 = vpack.c.bf16 %v594_v34, %v592_v27 }
 0x300   : > { %v696_v42 = vadd.f32 %v594_v34, %v593_v32 }
 0x301   : > { %v1602_v43 = vpop.eup %1601  ;;  %v595_v44 = vmax.f32 %v577_v38, 0.0  ;;  %v596_v17 = vmax.f32 %v579_v39, 0.0  ;;  %778 = vmatprep.mubr.bf16.mxu1 %v602_v40  ;;  %v734_v39 = vld [vmem:[#allocation5] sm:$0xf] }
 0x302   : > { %v1604_v19 = vpop.eup %1603  ;;  %v484_v45 = vpop.permute.xlu1 %483  ;;  %v744_v46 = vpack.c.bf16 %v1602_v43, %v1602_v43  ;;  %v736_v8 = vsel %vm616_vm4, %v1602_v43, 0.0 }
 0x303   : > { %v583_v47 = vadd.f32 %v582_v5, %v484_v45  ;;  %v585_v48 = vadd.f32 %v584_v6, %v484_v45  ;;  %v745_v49 = vpack.c.bf16 %v1604_v19, %v1604_v19  ;;  %v699_v50 = vadd.f32 %v596_v17, %v595_v44 }
 0x304   : > { %v737_v9 = vsel %vm616_vm4, %v1604_v19, 0.0 }
 0x305   : > { %v597_v51 = vmax.f32 %v583_v47, 0.0  ;;  %v598_v52 = vmax.f32 %v585_v48, 0.0  ;;  %746 = vmatprep.subr.bf16.mxu1 %v745_v49  ;;  %v738_v12 = vadd.f32 %v737_v9, %v736_v8  ;;  %v690_v47 = vld [vmem:[#allocation3 + $0x8] sm:$0xff] }
 0x306   : > { %747 = vmatpush1.bf16.xpose.msra.mxu1 %v744_v46  ;;  %v868_v53 = vpop.permute.xlu1 %867 }
 0x307   : > { %v870_v54 = vmul.f32 %v868_v53, %v1975_v14  ;;  %v604_v55 = vpack.c.bf16 %v598_v52, %v596_v17  ;;  %v603_v57 = vpack.c.bf16 %v597_v51, %v595_v44  ;;  %v702_v60 = vadd.f32 %v598_v52, %v597_v51  ;;  %v689_v44 = vld [vmem:[#allocation3] sm:$0xff]  ;;  %v692_v51 = vld [vmem:[#allocation3 + $0x18] sm:$0xff] }
 0x309   : > { %872 = vrot.lane.b32.xlu0 %v870_v54, %s1739_s29 }
 0x30a   : > { %v896_v61 = vpop.permute.xlu1 %895 }
 0x30b   : > { %v898_v62 = vmul.f32 %v896_v61, %v1975_v14 }
 0x30d   : > { %779 = vmatmul.mubr.bf16.vlgmr.msra.gmra.mrb[4].mxu1 %v601_v37  ;;  %900 = vrot.lane.b32.xlu0 %v898_v62, %s2205_s17 }
 0x30e   : > { %786 = vmatprep.mubr.bf16.mxu1 %v604_v55  ;;  %v910_v63 = vpop.permute.xlu1 %909 }
 0x30f   : > { %v912_v0 = vmul.f32 %v910_v63, %v1975_v14 }
 0x311   : > { %914 = vrot.lane.b32.xlu1 %v912_v0, %s1741_s20 }
 0x312   : > { %v924_v1 = vpop.permute.xlu1 %923 }
 0x313   : > { %v926_v2 = vmul.f32 %v924_v1, %v1975_v14 }
 0x315   : > { %787 = vmatmul.mubr.bf16.gmra.mrb[8].mxu1 %v603_v57  ;;  %928 = vrot.lane.b32.xlu1 %v926_v2, %s1742_s27 }
 0x316   : > { %v938_v3 = vpop.permute.xlu1 %937  ;;  %1501 = vmatprep.mubr.msk.f32.mxu1 %vm1746_vm8, %v1729_v11 }
 0x317   : > { %v940_v5 = vmul.f32 %v938_v3, %v1975_v14 }
 0x319   : > { %942 = vrot.lane.b32.xlu1 %v940_v5, %s1743_s28  ;;  %s2216_s28 = smov 2  }
 0x31a   : > { %v952_v6 = vpop.permute.xlu1 %951 }
 0x31b   : > { %v954_v7 = vmul.f32 %v952_v6, %v1975_v14  ;;  %v721_v14 = vmul.f32 1.442695, %v720_v59  ;;  %v691_v59 = vld [vmem:[#allocation3 + $0x10] sm:$0xff] }
 0x31d   : > { %956 = vrot.lane.b32.xlu1 %v954_v7, %s1744_s30  ;;  %1605 = vpow2.f32 %v721_v14 }
 0x31e   : > { %v887_v16 = vpop.permute.xlu1 %886 }
 0x327   : > { %v1606_v38 = vpop.eup %1605 }
 0x328   : > { %v735_v40 = vmul.f32 %v1606_v38, %v734_v39 }
 0x32c   : > { %739 = vadd.xlane.f32.xlu0 %v738_v12  ;;  %v828_v12 = vld [vmem:[#allocation6 + $0x8] sm:$0xff] }
 0x330   : > { %694 = vadd.xlane.f32.xlu0 %v693_v31 }
 0x334   : > { %697 = vadd.xlane.f32.xlu0 %v696_v42 }
 0x338   : > { %700 = vadd.xlane.f32.xlu0 %v699_v50 }
 0x33c   : > { %703 = vadd.xlane.f32.xlu0 %v702_v60 }
 0x37b   : > { %v873_v22 = vpop.permute.xlu0 %872 }
 0x37c   : > { %v875_v24 = vadd.f32 %v873_v22, %v861_v23 }
 0x37e   : > { %v889_v26 = vadd.f32 %v887_v16, %v875_v24 }
 0x37f   : > { %v901_v27 = vpop.permute.xlu0 %900 }
 0x380   : > { %v903_v29 = vadd.f32 %v901_v27, %v889_v26 }
 0x383   : > { %v915_v21 = vpop.permute.xlu1 %914 }
 0x384   : > { %v917_v30 = vadd.f32 %v915_v21, %v903_v29 }
 0x387   : > { %v929_v25 = vpop.permute.xlu1 %928 }
 0x388   : > { %v931_v31 = vadd.f32 %v929_v25, %v917_v30 }
 0x38b   : > { %v943_v28 = vpop.permute.xlu1 %942 }
 0x38c   : > { %v945_v41 = vadd.f32 %v943_v28, %v931_v31 }
 0x38f   : > { %v957_v32 = vpop.permute.xlu1 %956 }
 0x390   : > { %v959_v34 = vadd.f32 %v957_v32, %v945_v41 }
 0x392   : > { %v960_v36 = vsub.f32 0.0, %v959_v34 }
 0x394   : > { %v961_v37 = vmul.f32 1.442695, %v960_v36 }
 0x396   : > { %1607 = vpow2.f32 %v961_v37 }
 0x3a0   : > { %v1608_v17 = vpop.eup %1607 }
 0x3a1   : > { %v963_v46 = vadd.f32 1.0, %v1608_v17 }
 0x3a3   : > { %1609 = vrcp.f32 %v963_v46  ;;  %v1163_v46 = vld [vmem:[%s2197_s7 + $0x8] sm:$0xff] }
 0x3ad   : > { %v2008_v54 = vpop.eup %1609 }
 0x3ae   : > { %v1077_v11 = vsel %vm674_vm6, %v2008_v54, 0.0 }
 0x3b9   : > { %v740_v42 = vpop.xlane.xlu0 %739 }
 0x3ba   : > { %v741_v43 = vadd.f32 %v740_v42, %v735_v40 }
 0x3bc   : > { %743 = vst.msk [vmem:[#allocation5] sm:$0xf] %vm674_vm6, %v741_v43 }
 0x3bd   : > { %v695_v19 = vpop.xlane.xlu0 %694 }
 0x3be   : > { %v705_v45 = vadd.f32 %v695_v19, %v689_v44 }
 0x3c0   : > { %709 = vst.msk [vmem:[#allocation3] sm:$0xff] %vm668_vm3, %v705_v45  ;;  %v1162_v45 = vld [vmem:[%s2197_s7] sm:$0xff] }
 0x3c1   : > { %v698_v56 = vpop.xlane.xlu0 %697 }
 0x3c2   : > { %v706_v58 = vadd.f32 %v698_v56, %v690_v47  ;;  %v1243_v47 = vld [vmem:[%s2199_s9] sm:$0xff]  ;;  %v1745_v56 = vmov 0.0|0.0  }
 0x3c3   : > { %v966_v48 = vld [vmem:[#allocation5] sm:$0xf]  ;;  %1504 = vmatprep.subr.bf16.mxu0 %v1745_v56  ;;  %1510 = vmatprep.subr.bf16.mxu1 %v1745_v56 }
 0x3c4   : > { %710 = vst.msk [vmem:[#allocation3 + $0x8] sm:$0xff] %vm668_vm3, %v706_v58  ;;  %1611 = vrcp.f32 %v966_v48  ;;  %v1505_v58 = vpack.c.bf16 %v1163_v46, %v1162_v45  ;;  %v1164_v48 = vld [vmem:[%s2197_s7 + $0x10] sm:$0xff] }
 0x3c5   : > { %v701_v49 = vpop.xlane.xlu0 %700 }
 0x3c6   : > { %v707_v50 = vadd.f32 %v701_v49, %v691_v59  ;;  %v1244_v59 = vld [vmem:[%s2199_s9 + $0x8] sm:$0xff]  ;;  %v1165_v49 = vld [vmem:[%s2197_s7 + $0x18] sm:$0xff]  ;;  %1506 = vmatpush3.bf16.msra.mxu0 %v1505_v58 }
 0x3c7   : > { %1507 = vmatprep.subr.bf16.mxu0 %v1745_v56 }
 0x3c8   : > { %711 = vst.msk [vmem:[#allocation3 + $0x10] sm:$0xff] %vm668_vm3, %v707_v50  ;;  %v1511_v50 = vpack.c.bf16 %v1244_v59, %v1243_v47 }
 0x3c9   : > { %v704_v52 = vpop.xlane.xlu0 %703 }
 0x3ca   : > { %v708_v53 = vadd.f32 %v704_v52, %v692_v51  ;;  %v1245_v51 = vld [vmem:[%s2199_s9 + $0x10] sm:$0xff]  ;;  %v1246_v52 = vld [vmem:[%s2199_s9 + $0x18] sm:$0xff]  ;;  %1512 = vmatpush3.bf16.msra.mxu1 %v1511_v50 }
 0x3cb   : > { %1513 = vmatprep.subr.bf16.mxu1 %v1745_v56 }
 0x3cc   : > { %712 = vst.msk [vmem:[#allocation3 + $0x18] sm:$0xff] %vm668_vm3, %v708_v53 }
 0x3ce   : > { %v1612_v55 = vpop.eup %1611 }
 0x3cf   : > { %v968_v57 = vmul.f32 %v1612_v55, %v2008_v54  ;;  %v1508_v55 = vpack.c.bf16 %v1165_v49, %v1164_v48 }
 0x3d1   : > { %v984_v60 = vrot.slane %v968_v57, %v864_v4  ;;  %v1016_v61 = vrot.slane %v968_v57, %v878_v35  ;;  %v1048_v62 = vrot.slane %v968_v57, %v892_v10  ;;  %v827_v35 = vld [vmem:[#allocation6] sm:$0xff]  ;;  %v976_v41 = vrot.slane %v968_v57, %v1992_v13  ;;  %1509 = vmatpush3.bf16.msra.mxu0 %v1508_v55 }
 0x3d2   : > { %v1514_v57 = vpack.c.bf16 %v1246_v52, %v1245_v51 }
 0x3d3   : > { %986 = vrot.lane.b32.xlu1 %v984_v60, %s1732_s18  ;;  %v1090_v60 = vld [vmem:[#allocation3] sm:$0xff]  ;;  %s2206_s18 = sshll.u32 %s1717_s24, 4 }
 0x3d4   : > { %1515 = vmatpush3.bf16.msra.mxu1 %v1514_v57 }
 0x3d7   : > { %1018 = vrot.lane.b32.xlu1 %v1016_v61, %s2216_s28  ;;  %v1094_v61 = vmul.f32 0.00390625, %v1090_v60  ;;  %s2105_s28 = scalar_lea.hbm %s2201_s11, %s2206_s18 }
 0x3db   : > { %1050 = vrot.lane.b32.xlu1 %v1048_v62, %s1733_s19  ;;  %v1091_v62 = vld [vmem:[#allocation3 + $0x8] sm:$0xff] }
 0x3e0   : > { %v780_v63 = vpop.f32.mrb[4].mxu1 }
 0x3e1   : > { %v782_v0 = vpop.f32.mrb[5].mxu1 }
 0x3e2   : > { %v783_v1 = vpop.f32.mrb[6].mxu1  ;;  %v1092_v0 = vld [vmem:[#allocation3 + $0x10] sm:$0xff] }
 0x3e3   : > { %v785_v2 = vpop.f32.mrb[7].mxu1 }
 0x3e4   : > { %v1093_v2 = vld [vmem:[#allocation3 + $0x18] sm:$0xff] }
 0x3e8   : > { %v788_v3 = vpop.f32.mrb[8].mxu1 }
 0x3e9   : > { %v790_v5 = vpop.f32.mrb[9].mxu1 }
 0x3ea   : > { %v791_v6 = vpop.f32.mrb[10].mxu1  ;;  %v1078_v5 = vrot.slane %v1077_v11, 4 }
 0x3eb   : > { %v793_v4 = vpop.f32.mrb[11].mxu1 }
 0x404   : > { %795 = vxpose.xlu1.b32.start.end [1/1] (short) (narrow) %v1606_v38, 8 }
 0x445   : > { %v987_v7 = vpop.permute.xlu1 %986 }
 0x449   : > { %v1019_v8 = vpop.permute.xlu1 %1018 }
 0x44d   : > { %v2028_v9 = vpop.permute.xlu1 %1050 }
 0x484   : > { %v811_v10 = vpop.trf.xlu1 }
 0x485   : > { %v834_v16 = vrot.slane %v811_v10, %v1992_v13 }
 0x487   : > { %v835_v18 = vmul.f32 %v834_v16, %v827_v35  ;;  %v836_v20 = vmul.f32 %v834_v16, %v828_v12  ;;  %v837_v21 = vmul.f32 %v834_v16, %v829_v15  ;;  %v838_v22 = vmul.f32 %v834_v16, %v830_v33 }
 0x489   : > { %v839_v23 = vadd.f32 %v835_v18, %v780_v63  ;;  %v840_v24 = vadd.f32 %v836_v20, %v783_v1  ;;  %v841_v25 = vadd.f32 %v837_v21, %v788_v3  ;;  %v842_v26 = vadd.f32 %v838_v22, %v791_v6 }
 0x48a   : > { %v1095_v63 = vmul.f32 0.00390625, %v1091_v62  ;;  %v1096_v1 = vmul.f32 0.00390625, %v1092_v0  ;;  %v1097_v3 = vmul.f32 0.00390625, %v1093_v2  ;;  %v1079_v6 = vadd.f32 %v1078_v5, %v1077_v11 }
 0x48b   : > { %844 = vst.msk [vmem:[#allocation6] sm:$0xff] %vm677_vm7, %v839_v23  ;;  %845 = vst.msk [vmem:[#allocation6 + $0x8] sm:$0xff] %vm677_vm7, %v840_v24 }
 0x48c   : > { %846 = vst.msk [vmem:[#allocation6 + $0x10] sm:$0xff] %vm677_vm7, %v841_v25  ;;  %847 = vst.msk [vmem:[#allocation6 + $0x18] sm:$0xff] %vm677_vm7, %v842_v26  ;;  %v1080_v4 = vrot.slane %v1079_v6, 2 }
 0x492   : > { %v970_v27 = vld [vmem:[#allocation6 + $0x8] sm:$0xff]  ;;  %v969_v28 = vld [vmem:[#allocation6] sm:$0xff] }
 0x493   : > { %v990_v29 = vmul.f32 %v987_v7, %v970_v27  ;;  %v989_v30 = vmul.f32 %v987_v7, %v969_v28  ;;  %v971_v31 = vld [vmem:[#allocation6 + $0x10] sm:$0xff]  ;;  %v972_v32 = vld [vmem:[#allocation6 + $0x18] sm:$0xff]  ;;  %v2038_v34 = vmul.f32 %v976_v41, %v970_v27  ;;  %v2040_v14 = vmul.f32 %v976_v41, %v969_v28 }
 0x494   : > { %v2042_v36 = vmul.f32 %v976_v41, %v971_v31  ;;  %v1024_v37 = vmul.f32 %v1019_v8, %v972_v32  ;;  %v1021_v38 = vmul.f32 %v1019_v8, %v969_v28  ;;  %v2044_v39 = vmul.f32 %v976_v41, %v972_v32 }
 0x495   : > { %999 = vrot.lane.b32.xlu1 %v990_v29, %s1739_s29  ;;  %997 = vrot.lane.b32.xlu0 %v989_v30, %s1739_s29  ;;  %v1056_v13 = vmul.f32 %v2028_v9, %v972_v32  ;;  %v991_v40 = vmul.f32 %v987_v7, %v971_v31  ;;  %v1022_v42 = vmul.f32 %v1019_v8, %v970_v27 }
 0x496   : > { %v1053_v43 = vmul.f32 %v2028_v9, %v969_v28  ;;  %v992_v44 = vmul.f32 %v987_v7, %v972_v32  ;;  %v1023_v17 = vmul.f32 %v1019_v8, %v971_v31  ;;  %v1054_v19 = vmul.f32 %v2028_v9, %v970_v27 }
 0x497   : > { %v1055_v53 = vmul.f32 %v2028_v9, %v971_v31  ;;  %v1081_v7 = vadd.f32 %v1080_v4, %v1079_v6 }
 0x499   : > { %1035 = vrot.lane.b32.xlu1 %v1024_v37, %s1738_s14  ;;  %1029 = vrot.lane.b32.xlu0 %v1021_v38, %s1738_s14  ;;  %v1082_v8 = vrot.slane %v1081_v7, 1 }
 0x49b   : > { %v1083_v9 = vadd.f32 %v1082_v8, %v1081_v7 }
 0x49d   : > { %1067 = vrot.lane.b32.xlu1 %v1056_v13, %s2205_s17  ;;  %1001 = vrot.lane.b32.xlu0 %v991_v40, %s1739_s29  ;;  %v1084_v12 = vadd.f32 1e-06, %v1083_v9 }
 0x49f   : > { %1613 = vrcp.f32 %v1084_v12 }
 0x4a1   : > { %1031 = vrot.lane.b32.xlu0 %v1022_v42, %s1738_s14 }
 0x4a5   : > { %1061 = vrot.lane.b32.xlu0 %v1053_v43, %s2205_s17 }
 0x4a9   : > { %1003 = vrot.lane.b32.xlu0 %v992_v44, %s1739_s29  ;;  %v1614_v23 = vpop.eup %1613  ;;  %s1747_s29 = smov [#allocation7]  }
 0x4aa   : > { %s1619_s1 = sshll.u32 %s1747_s29, 4  ;;  %s1620_s1 = int_to_ptr.vmem [resolvable:$false] %s1619_s1 }
 0x4ab   : > { %s1621_s2 = scalar_lea.vmem %s1620_s1, 32 }
 0x4ad   : > { %1033 = vrot.lane.b32.xlu0 %v1023_v17, %s1738_s14 }
 0x4b1   : > { %1063 = vrot.lane.b32.xlu0 %v1054_v19, %s2205_s17  ;;  %s2093_s17 = sand.u32 1, %s1709_s22  }
 0x4b2   : > { %s432_s19 = scalar_lea.vmem [#allocation7], %s2093_s17 }
 0x4b3   : > { %s1339_s30 = sshll.u32 %s432_s19, 4  ;;  %s2107_s30 = int_to_ptr.vmem [resolvable:$true] %s1339_s30 }
 0x4b4   : > { %s1615_s14 = scalar_lea.vmem %s2107_s30, 16  ;;  %p1622_p1 = scmp.lt.s32.totalorder %s2107_s30, %s1620_s1 }
 0x4b5   : > { %1065 = vrot.lane.b32.xlu0 %v1055_v53, %s2217_s0  ;;  %s1323_s0 = scalar_lea.sflag [#allocation8], %s2093_s17  ;;  %p1616_p12 = scmp.ne.s32.totalorder %s2107_s30, %s1615_s14 }
 0x4b6   : > { %p1623_p2 = scmp.lt.s32.totalorder %s1621_s2, %s1615_s14 }
 0x4b7   : > { %p1617_p13 = pnand %p1616_p12, %p1854_p4 }
 0x4b8   : > { %p1624_p3 = por %p1623_p2, %p1622_p1 }
 0x4b9   : > { %p1618_p0 = pneg %p1617_p13 }
 0x4bb   : > { %p1625_p5 = pnand %p1624_p3, %p1618_p0 }
 0x4d3   : > { %1098 = vxpose.xlu0.b32.start [1/4] (short) (narrow) %v1094_v61, 8 }
 0x4d7   : > { %1099 = vxpose.xlu0.b32.cont [2/4] (short) (narrow) %v1095_v63, 8 }
 0x4db   : > { %1100 = vxpose.xlu0.b32.cont [3/4] (short) (narrow) %v1096_v1, 8 }
 0x4df   : > { %1101 = vxpose.xlu0.b32.end [4/4] (short) (narrow) %v1097_v3, 8 }
 0x507   : > { %v998_v35 = vpop.permute.xlu0 %997  ;;  %v1000_v10 = vpop.permute.xlu1 %999 }
 0x508   : > { %v1009_v18 = vadd.f32 %v998_v35, %v2040_v14  ;;  %v1010_v30 = vadd.f32 %v1000_v10, %v2038_v34 }
 0x50b   : > { %v1030_v15 = vpop.permute.xlu0 %1029  ;;  %v1036_v54 = vpop.permute.xlu1 %1035 }
 0x50c   : > { %v1041_v20 = vadd.f32 %v1030_v15, %v1009_v18 }
 0x50f   : > { %v1002_v33 = vpop.permute.xlu0 %1001  ;;  %v1068_v28 = vpop.permute.xlu1 %1067 }
 0x510   : > { %v1011_v14 = vadd.f32 %v1002_v33, %v2042_v36  ;;  %v1166_v36 = vld [vmem:[%s2198_s8] sm:$0x1] }
 0x513   : > { %v1032_v16 = vpop.permute.xlu0 %1031 }
 0x514   : > { %v1042_v32 = vadd.f32 %v1032_v16, %v1010_v30 }
 0x517   : > { %v1062_v21 = vpop.permute.xlu0 %1061 }
 0x518   : > { %v1073_v22 = vadd.f32 %v1062_v21, %v1041_v20 }
 0x51a   : > { %v1086_v24 = vmul.f32 %v1614_v23, %v1073_v22 }
 0x51b   : > { %v1004_v25 = vpop.permute.xlu0 %1003 }
 0x51c   : > { %v1012_v26 = vadd.f32 %v1004_v25, %v2044_v39  ;;  %1130 = vxpose.xlu1.b32.start [1/4] (short) (narrow) %v1086_v24, 8 }
 0x51e   : > { %v1044_v27 = vadd.f32 %v1036_v54, %v1012_v26 }
 0x51f   : > { %v1034_v29 = vpop.permute.xlu0 %1033 }
 0x520   : > { %v1076_v31 = vadd.f32 %v1068_v28, %v1044_v27  ;;  %v1043_v13 = vadd.f32 %v1034_v29, %v1011_v14 }
 0x522   : > { %v1089_v41 = vmul.f32 %v1614_v23, %v1076_v31 }
 0x523   : > { %v1064_v37 = vpop.permute.xlu0 %1063 }
 0x524   : > { %v1074_v38 = vadd.f32 %v1064_v37, %v1042_v32 }
 0x526   : > { %v1087_v40 = vmul.f32 %v1614_v23, %v1074_v38 }
 0x527   : > { %v1066_v42 = vpop.permute.xlu0 %1065 }
 0x528   : > { %v1075_v43 = vadd.f32 %v1066_v42, %v1043_v13  ;;  %1131 = vxpose.xlu1.b32.cont [2/4] (short) (narrow) %v1087_v40, 8 }
 0x52a   : > { %v1088_v39 = vmul.f32 %v1614_v23, %v1075_v43 }
 0x52c   : > { %1132 = vxpose.xlu1.b32.cont [3/4] (short) (narrow) %v1088_v39, 8 }
 0x530   : > { %1133 = vxpose.xlu1.b32.end [4/4] (short) (narrow) %v1089_v41, 8 }
 0x553   : > { %v1114_v34 = vpop.trf.xlu0 }
 0x554   : > { %1491 = vmatmul.mubr.msk.f32.vlgmr.msra.gmra.mrb[12].mxu0 %vm1167_vm9, %v1114_v34 }
 0x5a4   : > { %v1146_v44 = vpop.trf.xlu1 }
 0x5a5   : > { %1502 = vmatmul.mubr.msk.f32.vlgmr.msra.gmra.mrb[12].mxu1 %vm1167_vm9, %v1146_v44 }
 0x627   : > { %v1237_v17 = vpop.f32.mrb[12].mxu0 }
 0x628   : > { %v1238_v19 = vadd.f32 %v1237_v17, %v1166_v36  ;;  %v1492_v45 = vpop.f32.mrb[13].mxu0 }
 0x62a   : > { %1242 = vst.msk [vmem:[%s432_s19] sm:$0x1] %vm1241_vm10, %v1238_v19 }
 0x62b   : > { %1628 = shalt.err (!%p1625_p5)
}
 0x62c   : > { %s1629_s19 = scalar_lea.hbm %s2105_s28, 16  ;;  %s1633_s29 = scalar_lea.hbm %s2201_s11, 32 }
 0x62d   : > { %p1630_p6 = scmp.ne.s32.totalorder %s2105_s28, %s1629_s19  ;;  %p1634_p10 = scmp.lt.u32.totalorder %s2105_s28, %s2201_s11 }
 0x62e   : > { %p1635_p11 = scmp.lt.u32.totalorder %s1633_s29, %s1629_s19  ;;  %p1637_p13 = scmp.lt.u32.totalorder %s1629_s19, %s2105_s28 }
 0x62f   : > { %p1631_p7 = pnand %p1630_p6, %p1854_p4 }
 0x630   : > { %p1636_p12 = por %p1635_p11, %p1634_p10 }
 0x631   : > { %p1632_p9 = pneg %p1631_p7 }
 0x632   : > { %p1638_p0 = por %p1637_p13, %p1636_p12 }
 0x634   : > { %p1639_p1 = pnand %p1638_p0, %p1632_p9 }
 0x636   : > { %1642 = shalt.err (!%p1639_p1)
}
 0x637   : > { %1516 = dma.vmem_to_hbm [thread:$0]  (%p1854_p4), %s2107_s30, 16, %s2105_s28, %s1323_s0   ;;  %v1247_v46 = vld [vmem:[%s2200_s10] sm:$0x1] }
 0x638   : > { %s438_s18 = scalar_lea.vmem [#allocation9], %s2093_s17  ;;  %s2218_s19 = sshll.u32 %s1717_s24, 4 }
 0x639   : > { %s1352_s20 = sshll.u32 %s438_s18, 4  ;;  %s2141_s1 = scalar_lea.hbm %s2202_s12, %s2218_s19  ;;  %s2143_s20 = int_to_ptr.vmem [resolvable:$true] %s1352_s20 }
 0x63a   : > { %s1327_s30 = scalar_lea.sflag [#allocation10], %s2093_s17  ;;  %s1643_s28 = scalar_lea.vmem %s2143_s20, 16 }
 0x63b   : > { %p1644_p2 = scmp.ne.s32.totalorder %s2143_s20, %s1643_s28  ;;  %s1748_s0 = smov [#allocation9]  }
 0x63c   : > { %s1647_s24 = sshll.u32 %s1748_s0, 4  ;;  %s1648_s24 = int_to_ptr.vmem [resolvable:$false] %s1647_s24 }
 0x63d   : > { %p1645_p3 = pnand %p1644_p2, %p1854_p4  ;;  %s1649_s2 = scalar_lea.vmem %s1648_s24, 32 }
 0x63e   : > { %p1650_p6 = scmp.lt.s32.totalorder %s2143_s20, %s1648_s24  ;;  %p1651_p7 = scmp.lt.s32.totalorder %s1649_s2, %s1643_s28 }
 0x63f   : > { %p1646_p5 = pneg %p1645_p3 }
 0x640   : > { %p1652_p9 = por %p1651_p7, %p1650_p6 }
 0x642   : > { %p1653_p10 = pnand %p1652_p9, %p1646_p5 }
 0x678   : > { %v1317_v47 = vpop.f32.mrb[12].mxu1 }
 0x679   : > { %v1318_v56 = vadd.f32 %v1317_v47, %v1247_v46  ;;  %v1503_v58 = vpop.f32.mrb[13].mxu1 }
 0x67b   : > { %1321 = vst.msk [vmem:[%s438_s18] sm:$0x1] %vm1241_vm10, %v1318_v56 }
 0x67c   : > { %1656 = shalt.err (!%p1653_p10)
}
 0x67d   : > { %s1657_s17 = scalar_lea.hbm %s2141_s1, 16  ;;  %s1661_s19 = scalar_lea.hbm %s2202_s12, 32 }
 0x67e   : > { %p1658_p11 = scmp.ne.s32.totalorder %s2141_s1, %s1657_s17  ;;  %p1662_p0 = scmp.lt.u32.totalorder %s2141_s1, %s2202_s12 }
 0x67f   : > { %p1663_p1 = scmp.lt.u32.totalorder %s1661_s19, %s1657_s17  ;;  %p1665_p3 = scmp.lt.u32.totalorder %s1657_s17, %s2141_s1 }
 0x680   : > { %p1659_p12 = pnand %p1658_p11, %p1854_p4 }
 0x681   : > { %p1664_p2 = por %p1663_p1, %p1662_p0 }
 0x682   : > { %p1660_p13 = pneg %p1659_p12 }
 0x683   : > { %p1666_p5 = por %p1665_p3, %p1664_p2 }
 0x685   : > { %p1667_p6 = pnand %p1666_p5, %p1660_p13 }
 0x687   : > { %1670 = shalt.err (!%p1667_p6)
}
 0x688   : > { %1517 = dma.vmem_to_hbm [thread:$0]  (%p1854_p4), %s2143_s20, 16, %s2141_s1, %s1327_s30  }
 0x689 PF: > { %p1527_p7 = scmp.ge.s32.totalorder %s1725_s26, 2  ;;  %s1364_s28 = sand.u32 1, %s1705_s21  }
 0x68a   : > { %s1365_s0 = scalar_lea.sflag [#allocation8], %s1364_s28 }
 0x68b   : > { %p1521_p9 = pnand %p1527_p7, %p1861_p8 }
 0x68d   : > { %1696 = dma.done.wait (!%p1521_p9), %s1365_s0, 16  }
 0x68e   : > { %1698 = vsyncadd (!%p1521_p9), %s1365_s0, 4294967280  ;;  %s1373_s24 = scalar_lea.sflag [#allocation10], %s1364_s28 }
 0x68f   : > { %1700 = dma.done.wait (!%p1521_p9), %s1373_s24, 16  }
 0x690   : > { %1702 = vsyncadd (!%p1521_p9), %s1373_s24, 4294967280  ;;  %s29_s26 = sadd.s32 1, %s1725_s26   ;;  %s2219_s13 = sld [smem:[#allocation13_spill]] }
 0x691   : > { %p26_p10 = scmp.ge.s32.totalorder %s29_s26, 4   ;;  %s2220_s21 = smov %s1709_s22 }
 0x692   : > { %s2221_s22 = smov %s1713_s23  ;;  %s2222_s23 = smov %s1867_s16 }
 0x693   : > { %s2223_s24 = smov %s1721_s25  ;;  %28 = sbr.rel (!%p26_p10) target bundleno = 10 (0xa), region = 124 }
 0x696   : > { %s2224_s25 = smov %s2219_s13 }
 0x69a   :  { %1377 = vsyncpa [#allocation8], 1 }
 0x69b   :  { %1379 = vsyncpa [#allocation8 + $0x1], 1 }
 0x69c   :  { %1380 = vsyncpa [#allocation10], 1 }
 0x69d   :  { %1382 = vsyncpa [#allocation10 + $0x1], 1 }

</bundles_post_ra>
